<compile_context>
chip_gen: v7x
topology: tpu7x:2x2x1
jax: 0.10.0
libtpu: 0.0.40
codegen_flags: <defaults>
</compile_context>

<pallas_src>
import jax
import jax.numpy as jnp
from jax.experimental import pallas as pl
from jax.experimental.pallas import tpu as pltpu

# ----------------------------- model hyper-params (scaled-down deberta-base) ---------------
B = 2          # batch
S = 8          # sequence length (config.lm_max_length analogue)
HIDDEN = 32    # hidden size (768 in deberta-base)
NH = 4         # attention heads (12 in deberta-base)
DH = HIDDEN // NH
INTER = 128    # intermediate FFN size (3072 in deberta-base)
LAYERS = 2     # encoder layers (12 in deberta-base)
VOCAB = 128
MAX_POS = 64
EPS = 1e-7     # deberta layer_norm_eps
LANE = 128     # lane padding for the pooled output / small-vector slab width

# rows inside the coalesced per-layer small-vector slab (L, 8, LANE)
_V_BQKV, _V_BO, _V_LN1G, _V_LN1B, _V_B1, _V_B2, _V_LN2G, _V_LN2B = range(8)


# ----------------------------- fused encoder + pooler kernel --------------------------------


def _layer_norm(x, g, b):
    mu = jnp.mean(x, axis=-1, keepdims=True)
    var = jnp.mean(jnp.square(x - mu), axis=-1, keepdims=True)
    return (x - mu) * jax.lax.rsqrt(var + EPS) * g + b


def deberta_kernel(x_ref, bias_ref, wqkv_ref, wo_ref, w1_ref, w2_ref, vec_ref,
                   wp_ref, bp_ref, pooled_ref):
    """One batch row per grid step: all encoder layers + ContextPooler.

    All weights are layer-stacked, constant-index inputs (DMA'd into VMEM exactly once for
    the whole kernel); the activation lives entirely in vregs at these dims.
    """
    h = x_ref[0]                               # (S, H) f32 embeddings for this row
    key_bias = bias_ref[0]                     # (1, S) additive key-mask bias
    scale = 1.0 / (DH ** 0.5)
    # TODO(synk): DeBERTa's disentangled relative-position (c2p/p2c) bias terms and its
    # 1/sqrt(3*d) scaling have no clean small-kernel equivalent; standard scaled dot-product
    # attention is used instead.

    # Static Python loop (LAYERS is tiny and static): static ref slices, full scheduler
    # visibility, and no per-layer grid-step overhead.
    for l in range(LAYERS):
        vec = vec_ref[l]                       # (8, LANE) f32 coalesced small params
        b_qkv = vec[_V_BQKV, :3 * HIDDEN]
        b_o = vec[_V_BO, :HIDDEN]
        ln1_g = vec[_V_LN1G, :HIDDEN]
        ln1_b = vec[_V_LN1B, :HIDDEN]
        b1 = vec[_V_B1, :INTER]
        b2 = vec[_V_B2, :HIDDEN]
        ln2_g = vec[_V_LN2G, :HIDDEN]
        ln2_b = vec[_V_LN2B, :HIDDEN]

        # ---- self-attention: single lane-dense QKV matmul, heads split afterwards ---------
        hb = h.astype(jnp.bfloat16)
        qkv = jnp.dot(hb, wqkv_ref[l], preferred_element_type=jnp.float32) + b_qkv  # (S, 3H)
        q = qkv[:, :HIDDEN].reshape(S, NH, DH).transpose(1, 0, 2)                   # (NH,S,DH)
        k = qkv[:, HIDDEN:2 * HIDDEN].reshape(S, NH, DH).transpose(1, 0, 2)
        v = qkv[:, 2 * HIDDEN:].reshape(S, NH, DH).transpose(1, 0, 2)

        s = jnp.einsum('nqd,nkd->nqk', q.astype(jnp.bfloat16), k.astype(jnp.bfloat16),
                       preferred_element_type=jnp.float32) * scale
        s = s + key_bias                                         # mask padded keys
        s = s - jnp.max(s, axis=-1, keepdims=True)
        p = jnp.exp(s)
        p = p * pl.reciprocal(jnp.sum(p, axis=-1, keepdims=True), approx=True)  # EUP recip
        ctx = jnp.einsum('nqk,nkd->nqd', p.astype(jnp.bfloat16), v.astype(jnp.bfloat16),
                         preferred_element_type=jnp.float32)                    # (NH, S, DH)

        # ---- output projection: one (S,H)@(H,H) matmul on the flattened context -----------
        ctx2d = ctx.transpose(1, 0, 2).reshape(S, HIDDEN)
        attn = jnp.dot(ctx2d.astype(jnp.bfloat16), wo_ref[l],
                       preferred_element_type=jnp.float32) + b_o
        h = _layer_norm(attn + h, ln1_g, ln1_b)

        # ---- feed-forward: dense -> gelu -> dense ------------------------------------------
        ff = jnp.dot(h.astype(jnp.bfloat16), w1_ref[l],
                     preferred_element_type=jnp.float32) + b1
        # TODO(synk): HF DeBERTa uses exact erf gelu; tanh-approx gelu kept (EUP-native).
        ff = jax.nn.gelu(ff)
        ff = jnp.dot(ff.astype(jnp.bfloat16), w2_ref[l],
                     preferred_element_type=jnp.float32) + b2
        h = _layer_norm(ff + h, ln2_g, ln2_b)

    # ---- ContextPooler: dense + gelu on token 0; lane-dense (1, 1, 128) store ---------------
    pooled = jnp.dot(h[0:1, :].astype(jnp.bfloat16), wp_ref[...],
                     preferred_element_type=jnp.float32) + bp_ref[...]
    pooled_ref[...] = jax.nn.gelu(pooled)[None, :, :].astype(pooled_ref.dtype)


# ----------------------------- wrapper (pallas_call glue) -----------------------------------


def _const3(shape):
    return pl.BlockSpec(shape, lambda b: (0, 0, 0))


def _const2(shape):
    return pl.BlockSpec(shape, lambda b: (0, 0))


def fused_encoder_pooler(x, attn_bias, packed, w_pool_pad, b_pool_pad):
    Bb, Ss, Hh = x.shape
    L = packed["w_qkv"].shape[0]

    grid_spec = pltpu.PrefetchScalarGridSpec(
        num_scalar_prefetch=0,
        grid=(Bb,),
        in_specs=[
            pl.BlockSpec((1, Ss, Hh), lambda b: (b, 0, 0)),       # embeddings, this row
            pl.BlockSpec((1, 1, Ss), lambda b: (b, 0, 0)),        # additive key-mask bias
            _const3((L, Hh, 3 * Hh)),                             # w_qkv (bf16), fetched once
            _const3((L, Hh, Hh)),                                 # w_o   (bf16)
            _const3((L, Hh, INTER)),                              # w1    (bf16)
            _const3((L, INTER, Hh)),                              # w2    (bf16)
            _const3((L, 8, LANE)),                                # coalesced small-vector slab
            _const2((Hh, LANE)),                                  # pooler weight (bf16, padded)
            _const2((1, LANE)),                                   # pooler bias   (f32, padded)
        ],
        out_specs=pl.BlockSpec((1, 1, LANE), lambda b: (b, 0, 0)),  # lane-dense pooled output
    )

    pooled = pl.pallas_call(
        deberta_kernel,
        out_shape=jax.ShapeDtypeStruct((Bb, 1, LANE), jnp.float32),
        grid_spec=grid_spec,
        compiler_params=pltpu.CompilerParams(
            dimension_semantics=("parallel",),       # batch rows across TensorCores
            # Generation-safe: below v7x's 64 MiB physical VMEM, far above the actual need
            # at these dims. At deberta-base dims: raise toward 64-96 MiB on v5e/v6e, keep
            # <= ~48 MiB (and tile the FFN / attention key axis) on v7x.
            vmem_limit_bytes=48 * 1024 * 1024,
        ),
    )(x, attn_bias, packed["w_qkv"], packed["w_o"], packed["w1"], packed["w2"],
      packed["vecs"], w_pool_pad, b_pool_pad)
    return pooled[:, 0, :HIDDEN]


def pack_layer_params(layers):
    """Layer-stack matmul weights (bf16) and coalesce the 8 small per-layer vectors into one
    lane-padded (L, 8, LANE) f32 slab. Pure JAX glue, done once outside the kernel."""
    assert INTER <= LANE and 3 * HIDDEN <= LANE

    def stack_bf16(name):
        return jnp.stack([l[name] for l in layers]).astype(jnp.bfloat16)

    def row(v):
        v = v.reshape(-1)
        return jnp.pad(v, (0, LANE - v.shape[0]))

    vecs = jnp.stack([
        jnp.stack([row(l["b_qkv"]), row(l["b_o"]), row(l["ln1_g"]), row(l["ln1_b"]),
                   row(l["b1"]), row(l["b2"]), row(l["ln2_g"]), row(l["ln2_b"])])
        for l in layers
    ])                                                            # (L, 8, LANE) f32

    return {
        "w_qkv": stack_bf16("w_qkv"),    # (L, H, 3H)  natural layout (no head-major repack)
        "w_o": stack_bf16("w_o"),        # (L, H, H)
        "w1": stack_bf16("w1"),          # (L, H, INTER)
        "w2": stack_bf16("w2"),          # (L, INTER, H)
        "vecs": vecs,
    }


# ----------------------------- full forward --------------------------------------------------


def deberta_forward(params, input_ids, attention_mask):
    """input_ids: (B,S) int32, attention_mask: (B,S) float32. Returns pooled (B, HIDDEN)."""
    # Embeddings (gather + LN + mask scale) in plain JAX glue — a kernel launch here is pure
    # overhead at these shapes.
    emb = jnp.take(params["word_emb"], input_ids, axis=0)                # (B, S, H)
    emb = emb + params["pos_emb"][None, :input_ids.shape[1], :]
    mu = jnp.mean(emb, axis=-1, keepdims=True)
    var = jnp.mean(jnp.square(emb - mu), axis=-1, keepdims=True)
    h0 = (emb - mu) * jax.lax.rsqrt(var + EPS) * params["emb_ln_g"] + params["emb_ln_b"]
    h0 = h0 * attention_mask[:, :, None]

    # Additive key-mask bias, hoisted out of the kernel (computed exactly once).
    attn_bias = (1.0 - attention_mask)[:, None, :] * (-1e9)              # (B, 1, S)

    packed = pack_layer_params(params["layers"])
    w_pool_pad = jnp.pad(params["w_pool"],
                         ((0, 0), (0, LANE - HIDDEN))).astype(jnp.bfloat16)   # (H, LANE)
    b_pool_pad = jnp.pad(params["b_pool"], ((0, 0), (0, LANE - HIDDEN)))      # (1, LANE)
    return fused_encoder_pooler(h0, attn_bias, packed, w_pool_pad, b_pool_pad)


# ----------------------------- deterministic param init --------------------------------------


def init_params(key):
    def dense(k, fan_in, fan_out):
        return jax.random.normal(k, (fan_in, fan_out), jnp.float32) * 0.02

    keys = iter(jax.random.split(key, 8 + LAYERS * 8))
    params = {
        "word_emb": jax.random.normal(next(keys), (VOCAB, HIDDEN), jnp.float32) * 0.02,
        "pos_emb": jax.random.normal(next(keys), (MAX_POS, HIDDEN), jnp.float32) * 0.02,
        "emb_ln_g": jnp.ones((1, HIDDEN), jnp.float32),
        "emb_ln_b": jnp.zeros((1, HIDDEN), jnp.float32),
        "w_pool": dense(next(keys), HIDDEN, HIDDEN),
        "b_pool": jnp.zeros((1, HIDDEN), jnp.float32),
        "layers": [],
    }
    for _ in range(LAYERS):
        params["layers"].append({
            "w_qkv": dense(next(keys), HIDDEN, 3 * HIDDEN),
            "b_qkv": jnp.zeros((1, 3 * HIDDEN), jnp.float32),
            "w_o": dense(next(keys), HIDDEN, HIDDEN),
            "b_o": jnp.zeros((1, HIDDEN), jnp.float32),
            "ln1_g": jnp.ones((1, HIDDEN), jnp.float32),
            "ln1_b": jnp.zeros((1, HIDDEN), jnp.float32),
            "w1": dense(next(keys), HIDDEN, INTER),
            "b1": jnp.zeros((1, INTER), jnp.float32),
            "w2": dense(next(keys), INTER, HIDDEN),
            "b2": jnp.zeros((1, HIDDEN), jnp.float32),
            "ln2_g": jnp.ones((1, HIDDEN), jnp.float32),
            "ln2_b": jnp.zeros((1, HIDDEN), jnp.float32),
        })
    return params


# ----------------------------- main -----------------------------------------------------------

if __name__ == "__main__":
    key = jax.random.PRNGKey(0)
    pkey, ikey = jax.random.split(key)
    params = init_params(pkey)

    # TODO(synk): HF AutoTokenizer has no Pallas equivalent; take pre-tokenized ids directly.
    input_ids = jax.random.randint(ikey, (B, S), 0, VOCAB, dtype=jnp.int32)
    attention_mask = jnp.ones((B, S), jnp.float32).at[1, 6:].set(0.0)  # pad last 2 tokens of row 1

    pooled = deberta_forward(params, input_ids, attention_mask)
    pooled = jax.block_until_ready(pooled)

    assert pooled.shape == (B, HIDDEN)
    assert bool(jnp.all(jnp.isfinite(pooled)))
    print("KERNEL_OK")
</pallas_src>

<mosaic_0001>
module attributes {stable_mosaic.version = 11 : i64} {
  func.func @deberta_kernel(%arg0: i32, %arg1: memref<1x8x32xf32, #tpu.memory_space<vmem>>, %arg2: memref<1x1x8xf32, #tpu.memory_space<vmem>>, %arg3: memref<2x32x96xbf16, #tpu.memory_space<vmem>>, %arg4: memref<2x32x32xbf16, #tpu.memory_space<vmem>>, %arg5: memref<2x32x128xbf16, #tpu.memory_space<vmem>>, %arg6: memref<2x128x32xbf16, #tpu.memory_space<vmem>>, %arg7: memref<2x8x128xf32, #tpu.memory_space<vmem>>, %arg8: memref<32x128xbf16, #tpu.memory_space<vmem>>, %arg9: memref<1x128xf32, #tpu.memory_space<vmem>>, %arg10: memref<1x1x128xf32, #tpu.memory_space<vmem>>) attributes {dimension_semantics = [#tpu.dimension_semantics<parallel>], iteration_bounds = array<i64: 2>, scalar_prefetch = 0 : i64, scratch_operands = 0 : i64, tpu.core_type = #tpu.core_type<tc>, window_params = [{transform_indices = @transform_0, window_bounds = array<i64: 1, 8, 32>}, {transform_indices = @transform_1, window_bounds = array<i64: 1, 1, 8>}, {pipeline_mode = #tpu.pipeline_mode<synchronous>, transform_indices = @transform_2, window_bounds = array<i64: 2, 32, 96>}, {pipeline_mode = #tpu.pipeline_mode<synchronous>, transform_indices = @transform_3, window_bounds = array<i64: 2, 32, 32>}, {pipeline_mode = #tpu.pipeline_mode<synchronous>, transform_indices = @transform_4, window_bounds = array<i64: 2, 32, 128>}, {pipeline_mode = #tpu.pipeline_mode<synchronous>, transform_indices = @transform_5, window_bounds = array<i64: 2, 128, 32>}, {pipeline_mode = #tpu.pipeline_mode<synchronous>, transform_indices = @transform_6, window_bounds = array<i64: 2, 8, 128>}, {pipeline_mode = #tpu.pipeline_mode<synchronous>, transform_indices = @transform_7, window_bounds = array<i64: 32, 128>}, {pipeline_mode = #tpu.pipeline_mode<synchronous>, transform_indices = @transform_8, window_bounds = array<i64: 1, 128>}, {transform_indices = @transform_9, window_bounds = array<i64: 1, 1, 128>}]} {
    %c0 = arith.constant 0 : index
    %c0_0 = arith.constant 0 : index
    %c0_1 = arith.constant 0 : index
    %0 = vector.load %arg1[%c0, %c0_0, %c0_1] : memref<1x8x32xf32, #tpu.memory_space<vmem>>, vector<1x8x32xf32>
    %1 = vector.shape_cast %0 : vector<1x8x32xf32> to vector<8x32xf32>
    %c0_2 = arith.constant 0 : index
    %c0_3 = arith.constant 0 : index
    %c0_4 = arith.constant 0 : index
    %2 = vector.load %arg2[%c0_2, %c0_3, %c0_4] : memref<1x1x8xf32, #tpu.memory_space<vmem>>, vector<1x1x8xf32>
    %3 = vector.shape_cast %2 : vector<1x1x8xf32> to vector<1x8xf32>
    %c0_5 = arith.constant 0 : index
    %c0_6 = arith.constant 0 : index
    %c0_7 = arith.constant 0 : index
    %4 = vector.load %arg7[%c0_5, %c0_6, %c0_7] : memref<2x8x128xf32, #tpu.memory_space<vmem>>, vector<1x8x128xf32>
    %5 = vector.shape_cast %4 : vector<1x8x128xf32> to vector<8x128xf32>
    %6 = vector.extract_strided_slice %5 {offsets = [0, 0], sizes = [1, 96], strides = [1, 1]} : vector<8x128xf32> to vector<1x96xf32>
    %7 = vector.shape_cast %6 : vector<1x96xf32> to vector<96xf32>
    %8 = vector.extract_strided_slice %5 {offsets = [1, 0], sizes = [1, 32], strides = [1, 1]} : vector<8x128xf32> to vector<1x32xf32>
    %9 = vector.shape_cast %8 : vector<1x32xf32> to vector<32xf32>
    %10 = vector.extract_strided_slice %5 {offsets = [2, 0], sizes = [1, 32], strides = [1, 1]} : vector<8x128xf32> to vector<1x32xf32>
    %11 = vector.shape_cast %10 : vector<1x32xf32> to vector<32xf32>
    %12 = vector.extract_strided_slice %5 {offsets = [3, 0], sizes = [1, 32], strides = [1, 1]} : vector<8x128xf32> to vector<1x32xf32>
    %13 = vector.shape_cast %12 : vector<1x32xf32> to vector<32xf32>
    %14 = vector.extract_strided_slice %5 {offsets = [4, 0], sizes = [1, 128], strides = [1, 1]} : vector<8x128xf32> to vector<1x128xf32>
    %15 = vector.shape_cast %14 : vector<1x128xf32> to vector<128xf32>
    %16 = vector.extract_strided_slice %5 {offsets = [5, 0], sizes = [1, 32], strides = [1, 1]} : vector<8x128xf32> to vector<1x32xf32>
    %17 = vector.shape_cast %16 : vector<1x32xf32> to vector<32xf32>
    %18 = vector.extract_strided_slice %5 {offsets = [6, 0], sizes = [1, 32], strides = [1, 1]} : vector<8x128xf32> to vector<1x32xf32>
    %19 = vector.shape_cast %18 : vector<1x32xf32> to vector<32xf32>
    %20 = vector.extract_strided_slice %5 {offsets = [7, 0], sizes = [1, 32], strides = [1, 1]} : vector<8x128xf32> to vector<1x32xf32>
    %21 = vector.shape_cast %20 : vector<1x32xf32> to vector<32xf32>
    %22 = arith.truncf %1 : vector<8x32xf32> to vector<8x32xbf16>
    %c0_8 = arith.constant 0 : index
    %c0_9 = arith.constant 0 : index
    %c0_10 = arith.constant 0 : index
    %23 = vector.load %arg3[%c0_8, %c0_9, %c0_10] : memref<2x32x96xbf16, #tpu.memory_space<vmem>>, vector<1x32x96xbf16>
    %24 = vector.shape_cast %23 : vector<1x32x96xbf16> to vector<32x96xbf16>
    %cst = arith.constant dense<0.000000e+00> : vector<8x96xf32>
    %25 = tpu.matmul %22, %24, %cst {dimension_numbers = #tpu.dot_dimension_numbers<[1], [0], [0], [1], [0, 0, 1, 1], [], []>} : vector<8x32xbf16>, vector<32x96xbf16>, vector<8x96xf32> -> vector<8x96xf32>
    %26 = vector.shape_cast %7 : vector<96xf32> to vector<1x96xf32>
    %27 = vector.broadcast %26 : vector<1x96xf32> to vector<8x96xf32>
    %28 = arith.addf %25, %27 : vector<8x96xf32>
    %29 = vector.extract_strided_slice %28 {offsets = [0, 0], sizes = [8, 32], strides = [1, 1]} : vector<8x96xf32> to vector<8x32xf32>
    %30 = vector.shape_cast %29 : vector<8x32xf32> to vector<8x4x8xf32>
    %31 = tpu.transpose %30, [1, 0, 2] : vector<8x4x8xf32> -> vector<4x8x8xf32>
    %32 = vector.extract_strided_slice %28 {offsets = [0, 32], sizes = [8, 32], strides = [1, 1]} : vector<8x96xf32> to vector<8x32xf32>
    %33 = vector.shape_cast %32 : vector<8x32xf32> to vector<8x4x8xf32>
    %34 = tpu.transpose %33, [1, 0, 2] : vector<8x4x8xf32> -> vector<4x8x8xf32>
    %35 = vector.extract_strided_slice %28 {offsets = [0, 64], sizes = [8, 32], strides = [1, 1]} : vector<8x96xf32> to vector<8x32xf32>
    %36 = vector.shape_cast %35 : vector<8x32xf32> to vector<8x4x8xf32>
    %37 = tpu.transpose %36, [1, 0, 2] : vector<8x4x8xf32> -> vector<4x8x8xf32>
    %38 = arith.truncf %31 : vector<4x8x8xf32> to vector<4x8x8xbf16>
    %39 = arith.truncf %34 : vector<4x8x8xf32> to vector<4x8x8xbf16>
    "tpu.trace_start"() <{level = 10 : i32, message = "nqd,nkd->nqk"}> : () -> ()
    %cst_11 = arith.constant dense<0.000000e+00> : vector<4x8x8xf32>
    %40 = tpu.matmul %38, %39, %cst_11 {dimension_numbers = #tpu.dot_dimension_numbers<[2], [2], [1], [1], [0, 0, 0, 1, 1, 1], [0], [0]>} : vector<4x8x8xbf16>, vector<4x8x8xbf16>, vector<4x8x8xf32> -> vector<4x8x8xf32>
    "tpu.trace_stop"() : () -> ()
    %cst_12 = arith.constant 0.353553385 : f32
    %41 = vector.broadcast %cst_12 : f32 to vector<4x8x8xf32>
    %42 = arith.mulf %40, %41 : vector<4x8x8xf32>
    %43 = vector.shape_cast %3 : vector<1x8xf32> to vector<1x1x8xf32>
    %44 = vector.broadcast %43 : vector<1x1x8xf32> to vector<4x8x8xf32>
    %45 = arith.addf %42, %44 : vector<4x8x8xf32>
    %cst_13 = arith.constant dense<0xFF800000> : vector<4x8xf32>
    %46 = vector.multi_reduction <maximumf>, %45, %cst_13 [2] : vector<4x8x8xf32> to vector<4x8xf32>
    %47 = vector.shape_cast %46 : vector<4x8xf32> to vector<4x8x1xf32>
    %48 = vector.broadcast %47 : vector<4x8x1xf32> to vector<4x8x8xf32>
    %49 = arith.subf %45, %48 : vector<4x8x8xf32>
    %50 = math.exp %49 : vector<4x8x8xf32>
    %cst_14 = arith.constant dense<0.000000e+00> : vector<4x8xf32>
    %51 = vector.multi_reduction <add>, %50, %cst_14 [2] : vector<4x8x8xf32> to vector<4x8xf32>
    %52 = vector.shape_cast %51 : vector<4x8xf32> to vector<4x8x1xf32>
    %53 = tpu.reciprocal %52 {approx = true} : vector<4x8x1xf32> -> vector<4x8x1xf32>
    %54 = vector.broadcast %53 : vector<4x8x1xf32> to vector<4x8x8xf32>
    %55 = arith.mulf %50, %54 : vector<4x8x8xf32>
    %56 = arith.truncf %55 : vector<4x8x8xf32> to vector<4x8x8xbf16>
    %57 = arith.truncf %37 : vector<4x8x8xf32> to vector<4x8x8xbf16>
    "tpu.trace_start"() <{level = 10 : i32, message = "nqk,nkd->nqd"}> : () -> ()
    %cst_15 = arith.constant dense<0.000000e+00> : vector<4x8x8xf32>
    %58 = tpu.matmul %56, %57, %cst_15 {dimension_numbers = #tpu.dot_dimension_numbers<[2], [1], [1], [2], [0, 0, 0, 1, 1, 2], [0], [0]>} : vector<4x8x8xbf16>, vector<4x8x8xbf16>, vector<4x8x8xf32> -> vector<4x8x8xf32>
    "tpu.trace_stop"() : () -> ()
    %59 = tpu.transpose %58, [1, 0, 2] : vector<4x8x8xf32> -> vector<8x4x8xf32>
    %60 = vector.shape_cast %59 : vector<8x4x8xf32> to vector<8x32xf32>
    %61 = arith.truncf %60 : vector<8x32xf32> to vector<8x32xbf16>
    %c0_16 = arith.constant 0 : index
    %c0_17 = arith.constant 0 : index
    %c0_18 = arith.constant 0 : index
    %62 = vector.load %arg4[%c0_16, %c0_17, %c0_18] : memref<2x32x32xbf16, #tpu.memory_space<vmem>>, vector<1x32x32xbf16>
    %63 = vector.shape_cast %62 : vector<1x32x32xbf16> to vector<32x32xbf16>
    %cst_19 = arith.constant dense<0.000000e+00> : vector<8x32xf32>
    %64 = tpu.matmul %61, %63, %cst_19 {dimension_numbers = #tpu.dot_dimension_numbers<[1], [0], [0], [1], [0, 0, 1, 1], [], []>} : vector<8x32xbf16>, vector<32x32xbf16>, vector<8x32xf32> -> vector<8x32xf32>
    %65 = vector.shape_cast %9 : vector<32xf32> to vector<1x32xf32>
    %66 = vector.broadcast %65 : vector<1x32xf32> to vector<8x32xf32>
    %67 = arith.addf %64, %66 : vector<8x32xf32>
    %68 = arith.addf %67, %1 : vector<8x32xf32>
    %cst_20 = arith.constant dense<0.000000e+00> : vector<8xf32>
    %69 = vector.multi_reduction <add>, %68, %cst_20 [1] : vector<8x32xf32> to vector<8xf32>
    %70 = vector.shape_cast %69 : vector<8xf32> to vector<8x1xf32>
    %cst_21 = arith.constant 3.200000e+01 : f32
    %71 = vector.broadcast %cst_21 : f32 to vector<8x1xf32>
    %72 = arith.divf %70, %71 : vector<8x1xf32>
    %73 = vector.broadcast %72 : vector<8x1xf32> to vector<8x32xf32>
    %74 = arith.subf %68, %73 : vector<8x32xf32>
    %75 = arith.mulf %74, %74 : vector<8x32xf32>
    %cst_22 = arith.constant dense<0.000000e+00> : vector<8xf32>
    %76 = vector.multi_reduction <add>, %75, %cst_22 [1] : vector<8x32xf32> to vector<8xf32>
    %77 = vector.shape_cast %76 : vector<8xf32> to vector<8x1xf32>
    %cst_23 = arith.constant 3.200000e+01 : f32
    %78 = vector.broadcast %cst_23 : f32 to vector<8x1xf32>
    %79 = arith.divf %77, %78 : vector<8x1xf32>
    %80 = vector.broadcast %72 : vector<8x1xf32> to vector<8x32xf32>
    %81 = arith.subf %68, %80 : vector<8x32xf32>
    %cst_24 = arith.constant 1.000000e-07 : f32
    %82 = vector.broadcast %cst_24 : f32 to vector<8x1xf32>
    %83 = arith.addf %79, %82 : vector<8x1xf32>
    %84 = math.rsqrt %83 : vector<8x1xf32>
    %85 = vector.broadcast %84 : vector<8x1xf32> to vector<8x32xf32>
    %86 = arith.mulf %81, %85 : vector<8x32xf32>
    %87 = vector.shape_cast %11 : vector<32xf32> to vector<1x32xf32>
    %88 = vector.broadcast %87 : vector<1x32xf32> to vector<8x32xf32>
    %89 = arith.mulf %86, %88 : vector<8x32xf32>
    %90 = vector.shape_cast %13 : vector<32xf32> to vector<1x32xf32>
    %91 = vector.broadcast %90 : vector<1x32xf32> to vector<8x32xf32>
    %92 = arith.addf %89, %91 : vector<8x32xf32>
    %93 = arith.truncf %92 : vector<8x32xf32> to vector<8x32xbf16>
    %c0_25 = arith.constant 0 : index
    %c0_26 = arith.constant 0 : index
    %c0_27 = arith.constant 0 : index
    %94 = vector.load %arg5[%c0_25, %c0_26, %c0_27] : memref<2x32x128xbf16, #tpu.memory_space<vmem>>, vector<1x32x128xbf16>
    %95 = vector.shape_cast %94 : vector<1x32x128xbf16> to vector<32x128xbf16>
    %cst_28 = arith.constant dense<0.000000e+00> : vector<8x128xf32>
    %96 = tpu.matmul %93, %95, %cst_28 {dimension_numbers = #tpu.dot_dimension_numbers<[1], [0], [0], [1], [0, 0, 1, 1], [], []>} : vector<8x32xbf16>, vector<32x128xbf16>, vector<8x128xf32> -> vector<8x128xf32>
    %97 = vector.shape_cast %15 : vector<128xf32> to vector<1x128xf32>
    %98 = vector.broadcast %97 : vector<1x128xf32> to vector<8x128xf32>
    %99 = arith.addf %96, %98 : vector<8x128xf32>
    %100 = arith.mulf %99, %99 : vector<8x128xf32>
    %101 = arith.mulf %99, %100 : vector<8x128xf32>
    %cst_29 = arith.constant 4.471500e-02 : f32
    %102 = vector.broadcast %cst_29 : f32 to vector<8x128xf32>
    %103 = arith.mulf %102, %101 : vector<8x128xf32>
    %104 = arith.addf %99, %103 : vector<8x128xf32>
    %cst_30 = arith.constant 0.797884583 : f32
    %105 = vector.broadcast %cst_30 : f32 to vector<8x128xf32>
    %106 = arith.mulf %105, %104 : vector<8x128xf32>
    %107 = math.tanh %106 : vector<8x128xf32>
    %cst_31 = arith.constant 1.000000e+00 : f32
    %108 = vector.broadcast %cst_31 : f32 to vector<8x128xf32>
    %109 = arith.addf %108, %107 : vector<8x128xf32>
    %cst_32 = arith.constant 5.000000e-01 : f32
    %110 = vector.broadcast %cst_32 : f32 to vector<8x128xf32>
    %111 = arith.mulf %110, %109 : vector<8x128xf32>
    %112 = arith.mulf %99, %111 : vector<8x128xf32>
    %113 = arith.truncf %112 : vector<8x128xf32> to vector<8x128xbf16>
    %c0_33 = arith.constant 0 : index
    %c0_34 = arith.constant 0 : index
    %c0_35 = arith.constant 0 : index
    %114 = vector.load %arg6[%c0_33, %c0_34, %c0_35] : memref<2x128x32xbf16, #tpu.memory_space<vmem>>, vector<1x128x32xbf16>
    %115 = vector.shape_cast %114 : vector<1x128x32xbf16> to vector<128x32xbf16>
    %cst_36 = arith.constant dense<0.000000e+00> : vector<8x32xf32>
    %116 = tpu.matmul %113, %115, %cst_36 {dimension_numbers = #tpu.dot_dimension_numbers<[1], [0], [0], [1], [0, 0, 1, 1], [], []>} : vector<8x128xbf16>, vector<128x32xbf16>, vector<8x32xf32> -> vector<8x32xf32>
    %117 = vector.shape_cast %17 : vector<32xf32> to vector<1x32xf32>
    %118 = vector.broadcast %117 : vector<1x32xf32> to vector<8x32xf32>
    %119 = arith.addf %116, %118 : vector<8x32xf32>
    %120 = arith.addf %119, %92 : vector<8x32xf32>
    %cst_37 = arith.constant dense<0.000000e+00> : vector<8xf32>
    %121 = vector.multi_reduction <add>, %120, %cst_37 [1] : vector<8x32xf32> to vector<8xf32>
    %122 = vector.shape_cast %121 : vector<8xf32> to vector<8x1xf32>
    %cst_38 = arith.constant 3.200000e+01 : f32
    %123 = vector.broadcast %cst_38 : f32 to vector<8x1xf32>
    %124 = arith.divf %122, %123 : vector<8x1xf32>
    %125 = vector.broadcast %124 : vector<8x1xf32> to vector<8x32xf32>
    %126 = arith.subf %120, %125 : vector<8x32xf32>
    %127 = arith.mulf %126, %126 : vector<8x32xf32>
    %cst_39 = arith.constant dense<0.000000e+00> : vector<8xf32>
    %128 = vector.multi_reduction <add>, %127, %cst_39 [1] : vector<8x32xf32> to vector<8xf32>
    %129 = vector.shape_cast %128 : vector<8xf32> to vector<8x1xf32>
    %cst_40 = arith.constant 3.200000e+01 : f32
    %130 = vector.broadcast %cst_40 : f32 to vector<8x1xf32>
    %131 = arith.divf %129, %130 : vector<8x1xf32>
    %132 = vector.broadcast %124 : vector<8x1xf32> to vector<8x32xf32>
    %133 = arith.subf %120, %132 : vector<8x32xf32>
    %cst_41 = arith.constant 1.000000e-07 : f32
    %134 = vector.broadcast %cst_41 : f32 to vector<8x1xf32>
    %135 = arith.addf %131, %134 : vector<8x1xf32>
    %136 = math.rsqrt %135 : vector<8x1xf32>
    %137 = vector.broadcast %136 : vector<8x1xf32> to vector<8x32xf32>
    %138 = arith.mulf %133, %137 : vector<8x32xf32>
    %139 = vector.shape_cast %19 : vector<32xf32> to vector<1x32xf32>
    %140 = vector.broadcast %139 : vector<1x32xf32> to vector<8x32xf32>
    %141 = arith.mulf %138, %140 : vector<8x32xf32>
    %142 = vector.shape_cast %21 : vector<32xf32> to vector<1x32xf32>
    %143 = vector.broadcast %142 : vector<1x32xf32> to vector<8x32xf32>
    %144 = arith.addf %141, %143 : vector<8x32xf32>
    %c1 = arith.constant 1 : index
    %c0_42 = arith.constant 0 : index
    %c0_43 = arith.constant 0 : index
    %145 = vector.load %arg7[%c1, %c0_42, %c0_43] : memref<2x8x128xf32, #tpu.memory_space<vmem>>, vector<1x8x128xf32>
    %146 = vector.shape_cast %145 : vector<1x8x128xf32> to vector<8x128xf32>
    %147 = vector.extract_strided_slice %146 {offsets = [0, 0], sizes = [1, 96], strides = [1, 1]} : vector<8x128xf32> to vector<1x96xf32>
    %148 = vector.shape_cast %147 : vector<1x96xf32> to vector<96xf32>
    %149 = vector.extract_strided_slice %146 {offsets = [1, 0], sizes = [1, 32], strides = [1, 1]} : vector<8x128xf32> to vector<1x32xf32>
    %150 = vector.shape_cast %149 : vector<1x32xf32> to vector<32xf32>
    %151 = vector.extract_strided_slice %146 {offsets = [2, 0], sizes = [1, 32], strides = [1, 1]} : vector<8x128xf32> to vector<1x32xf32>
    %152 = vector.shape_cast %151 : vector<1x32xf32> to vector<32xf32>
    %153 = vector.extract_strided_slice %146 {offsets = [3, 0], sizes = [1, 32], strides = [1, 1]} : vector<8x128xf32> to vector<1x32xf32>
    %154 = vector.shape_cast %153 : vector<1x32xf32> to vector<32xf32>
    %155 = vector.extract_strided_slice %146 {offsets = [4, 0], sizes = [1, 128], strides = [1, 1]} : vector<8x128xf32> to vector<1x128xf32>
    %156 = vector.shape_cast %155 : vector<1x128xf32> to vector<128xf32>
    %157 = vector.extract_strided_slice %146 {offsets = [5, 0], sizes = [1, 32], strides = [1, 1]} : vector<8x128xf32> to vector<1x32xf32>
    %158 = vector.shape_cast %157 : vector<1x32xf32> to vector<32xf32>
    %159 = vector.extract_strided_slice %146 {offsets = [6, 0], sizes = [1, 32], strides = [1, 1]} : vector<8x128xf32> to vector<1x32xf32>
    %160 = vector.shape_cast %159 : vector<1x32xf32> to vector<32xf32>
    %161 = vector.extract_strided_slice %146 {offsets = [7, 0], sizes = [1, 32], strides = [1, 1]} : vector<8x128xf32> to vector<1x32xf32>
    %162 = vector.shape_cast %161 : vector<1x32xf32> to vector<32xf32>
    %163 = arith.truncf %144 : vector<8x32xf32> to vector<8x32xbf16>
    %c1_44 = arith.constant 1 : index
    %c0_45 = arith.constant 0 : index
    %c0_46 = arith.constant 0 : index
    %164 = vector.load %arg3[%c1_44, %c0_45, %c0_46] : memref<2x32x96xbf16, #tpu.memory_space<vmem>>, vector<1x32x96xbf16>
    %165 = vector.shape_cast %164 : vector<1x32x96xbf16> to vector<32x96xbf16>
    %cst_47 = arith.constant dense<0.000000e+00> : vector<8x96xf32>
    %166 = tpu.matmul %163, %165, %cst_47 {dimension_numbers = #tpu.dot_dimension_numbers<[1], [0], [0], [1], [0, 0, 1, 1], [], []>} : vector<8x32xbf16>, vector<32x96xbf16>, vector<8x96xf32> -> vector<8x96xf32>
    %167 = vector.shape_cast %148 : vector<96xf32> to vector<1x96xf32>
    %168 = vector.broadcast %167 : vector<1x96xf32> to vector<8x96xf32>
    %169 = arith.addf %166, %168 : vector<8x96xf32>
    %170 = vector.extract_strided_slice %169 {offsets = [0, 0], sizes = [8, 32], strides = [1, 1]} : vector<8x96xf32> to vector<8x32xf32>
    %171 = vector.shape_cast %170 : vector<8x32xf32> to vector<8x4x8xf32>
    %172 = tpu.transpose %171, [1, 0, 2] : vector<8x4x8xf32> -> vector<4x8x8xf32>
    %173 = vector.extract_strided_slice %169 {offsets = [0, 32], sizes = [8, 32], strides = [1, 1]} : vector<8x96xf32> to vector<8x32xf32>
    %174 = vector.shape_cast %173 : vector<8x32xf32> to vector<8x4x8xf32>
    %175 = tpu.transpose %174, [1, 0, 2] : vector<8x4x8xf32> -> vector<4x8x8xf32>
    %176 = vector.extract_strided_slice %169 {offsets = [0, 64], sizes = [8, 32], strides = [1, 1]} : vector<8x96xf32> to vector<8x32xf32>
    %177 = vector.shape_cast %176 : vector<8x32xf32> to vector<8x4x8xf32>
    %178 = tpu.transpose %177, [1, 0, 2] : vector<8x4x8xf32> -> vector<4x8x8xf32>
    %179 = arith.truncf %172 : vector<4x8x8xf32> to vector<4x8x8xbf16>
    %180 = arith.truncf %175 : vector<4x8x8xf32> to vector<4x8x8xbf16>
    "tpu.trace_start"() <{level = 10 : i32, message = "nqd,nkd->nqk"}> : () -> ()
    %cst_48 = arith.constant dense<0.000000e+00> : vector<4x8x8xf32>
    %181 = tpu.matmul %179, %180, %cst_48 {dimension_numbers = #tpu.dot_dimension_numbers<[2], [2], [1], [1], [0, 0, 0, 1, 1, 1], [0], [0]>} : vector<4x8x8xbf16>, vector<4x8x8xbf16>, vector<4x8x8xf32> -> vector<4x8x8xf32>
    "tpu.trace_stop"() : () -> ()
    %cst_49 = arith.constant 0.353553385 : f32
    %182 = vector.broadcast %cst_49 : f32 to vector<4x8x8xf32>
    %183 = arith.mulf %181, %182 : vector<4x8x8xf32>
    %184 = vector.shape_cast %3 : vector<1x8xf32> to vector<1x1x8xf32>
    %185 = vector.broadcast %184 : vector<1x1x8xf32> to vector<4x8x8xf32>
    %186 = arith.addf %183, %185 : vector<4x8x8xf32>
    %cst_50 = arith.constant dense<0xFF800000> : vector<4x8xf32>
    %187 = vector.multi_reduction <maximumf>, %186, %cst_50 [2] : vector<4x8x8xf32> to vector<4x8xf32>
    %188 = vector.shape_cast %187 : vector<4x8xf32> to vector<4x8x1xf32>
    %189 = vector.broadcast %188 : vector<4x8x1xf32> to vector<4x8x8xf32>
    %190 = arith.subf %186, %189 : vector<4x8x8xf32>
    %191 = math.exp %190 : vector<4x8x8xf32>
    %cst_51 = arith.constant dense<0.000000e+00> : vector<4x8xf32>
    %192 = vector.multi_reduction <add>, %191, %cst_51 [2] : vector<4x8x8xf32> to vector<4x8xf32>
    %193 = vector.shape_cast %192 : vector<4x8xf32> to vector<4x8x1xf32>
    %194 = tpu.reciprocal %193 {approx = true} : vector<4x8x1xf32> -> vector<4x8x1xf32>
    %195 = vector.broadcast %194 : vector<4x8x1xf32> to vector<4x8x8xf32>
    %196 = arith.mulf %191, %195 : vector<4x8x8xf32>
    %197 = arith.truncf %196 : vector<4x8x8xf32> to vector<4x8x8xbf16>
    %198 = arith.truncf %178 : vector<4x8x8xf32> to vector<4x8x8xbf16>
    "tpu.trace_start"() <{level = 10 : i32, message = "nqk,nkd->nqd"}> : () -> ()
    %cst_52 = arith.constant dense<0.000000e+00> : vector<4x8x8xf32>
    %199 = tpu.matmul %197, %198, %cst_52 {dimension_numbers = #tpu.dot_dimension_numbers<[2], [1], [1], [2], [0, 0, 0, 1, 1, 2], [0], [0]>} : vector<4x8x8xbf16>, vector<4x8x8xbf16>, vector<4x8x8xf32> -> vector<4x8x8xf32>
    "tpu.trace_stop"() : () -> ()
    %200 = tpu.transpose %199, [1, 0, 2] : vector<4x8x8xf32> -> vector<8x4x8xf32>
    %201 = vector.shape_cast %200 : vector<8x4x8xf32> to vector<8x32xf32>
    %202 = arith.truncf %201 : vector<8x32xf32> to vector<8x32xbf16>
    %c1_53 = arith.constant 1 : index
    %c0_54 = arith.constant 0 : index
    %c0_55 = arith.constant 0 : index
    %203 = vector.load %arg4[%c1_53, %c0_54, %c0_55] : memref<2x32x32xbf16, #tpu.memory_space<vmem>>, vector<1x32x32xbf16>
    %204 = vector.shape_cast %203 : vector<1x32x32xbf16> to vector<32x32xbf16>
    %cst_56 = arith.constant dense<0.000000e+00> : vector<8x32xf32>
    %205 = tpu.matmul %202, %204, %cst_56 {dimension_numbers = #tpu.dot_dimension_numbers<[1], [0], [0], [1], [0, 0, 1, 1], [], []>} : vector<8x32xbf16>, vector<32x32xbf16>, vector<8x32xf32> -> vector<8x32xf32>
    %206 = vector.shape_cast %150 : vector<32xf32> to vector<1x32xf32>
    %207 = vector.broadcast %206 : vector<1x32xf32> to vector<8x32xf32>
    %208 = arith.addf %205, %207 : vector<8x32xf32>
    %209 = arith.addf %208, %144 : vector<8x32xf32>
    %cst_57 = arith.constant dense<0.000000e+00> : vector<8xf32>
    %210 = vector.multi_reduction <add>, %209, %cst_57 [1] : vector<8x32xf32> to vector<8xf32>
    %211 = vector.shape_cast %210 : vector<8xf32> to vector<8x1xf32>
    %cst_58 = arith.constant 3.200000e+01 : f32
    %212 = vector.broadcast %cst_58 : f32 to vector<8x1xf32>
    %213 = arith.divf %211, %212 : vector<8x1xf32>
    %214 = vector.broadcast %213 : vector<8x1xf32> to vector<8x32xf32>
    %215 = arith.subf %209, %214 : vector<8x32xf32>
    %216 = arith.mulf %215, %215 : vector<8x32xf32>
    %cst_59 = arith.constant dense<0.000000e+00> : vector<8xf32>
    %217 = vector.multi_reduction <add>, %216, %cst_59 [1] : vector<8x32xf32> to vector<8xf32>
    %218 = vector.shape_cast %217 : vector<8xf32> to vector<8x1xf32>
    %cst_60 = arith.constant 3.200000e+01 : f32
    %219 = vector.broadcast %cst_60 : f32 to vector<8x1xf32>
    %220 = arith.divf %218, %219 : vector<8x1xf32>
    %221 = vector.broadcast %213 : vector<8x1xf32> to vector<8x32xf32>
    %222 = arith.subf %209, %221 : vector<8x32xf32>
    %cst_61 = arith.constant 1.000000e-07 : f32
    %223 = vector.broadcast %cst_61 : f32 to vector<8x1xf32>
    %224 = arith.addf %220, %223 : vector<8x1xf32>
    %225 = math.rsqrt %224 : vector<8x1xf32>
    %226 = vector.broadcast %225 : vector<8x1xf32> to vector<8x32xf32>
    %227 = arith.mulf %222, %226 : vector<8x32xf32>
    %228 = vector.shape_cast %152 : vector<32xf32> to vector<1x32xf32>
    %229 = vector.broadcast %228 : vector<1x32xf32> to vector<8x32xf32>
    %230 = arith.mulf %227, %229 : vector<8x32xf32>
    %231 = vector.shape_cast %154 : vector<32xf32> to vector<1x32xf32>
    %232 = vector.broadcast %231 : vector<1x32xf32> to vector<8x32xf32>
    %233 = arith.addf %230, %232 : vector<8x32xf32>
    %234 = arith.truncf %233 : vector<8x32xf32> to vector<8x32xbf16>
    %c1_62 = arith.constant 1 : index
    %c0_63 = arith.constant 0 : index
    %c0_64 = arith.constant 0 : index
    %235 = vector.load %arg5[%c1_62, %c0_63, %c0_64] : memref<2x32x128xbf16, #tpu.memory_space<vmem>>, vector<1x32x128xbf16>
    %236 = vector.shape_cast %235 : vector<1x32x128xbf16> to vector<32x128xbf16>
    %cst_65 = arith.constant dense<0.000000e+00> : vector<8x128xf32>
    %237 = tpu.matmul %234, %236, %cst_65 {dimension_numbers = #tpu.dot_dimension_numbers<[1], [0], [0], [1], [0, 0, 1, 1], [], []>} : vector<8x32xbf16>, vector<32x128xbf16>, vector<8x128xf32> -> vector<8x128xf32>
    %238 = vector.shape_cast %156 : vector<128xf32> to vector<1x128xf32>
    %239 = vector.broadcast %238 : vector<1x128xf32> to vector<8x128xf32>
    %240 = arith.addf %237, %239 : vector<8x128xf32>
    %241 = arith.mulf %240, %240 : vector<8x128xf32>
    %242 = arith.mulf %240, %241 : vector<8x128xf32>
    %cst_66 = arith.constant 4.471500e-02 : f32
    %243 = vector.broadcast %cst_66 : f32 to vector<8x128xf32>
    %244 = arith.mulf %243, %242 : vector<8x128xf32>
    %245 = arith.addf %240, %244 : vector<8x128xf32>
    %cst_67 = arith.constant 0.797884583 : f32
    %246 = vector.broadcast %cst_67 : f32 to vector<8x128xf32>
    %247 = arith.mulf %246, %245 : vector<8x128xf32>
    %248 = math.tanh %247 : vector<8x128xf32>
    %cst_68 = arith.constant 1.000000e+00 : f32
    %249 = vector.broadcast %cst_68 : f32 to vector<8x128xf32>
    %250 = arith.addf %249, %248 : vector<8x128xf32>
    %cst_69 = arith.constant 5.000000e-01 : f32
    %251 = vector.broadcast %cst_69 : f32 to vector<8x128xf32>
    %252 = arith.mulf %251, %250 : vector<8x128xf32>
    %253 = arith.mulf %240, %252 : vector<8x128xf32>
    %254 = arith.truncf %253 : vector<8x128xf32> to vector<8x128xbf16>
    %c1_70 = arith.constant 1 : index
    %c0_71 = arith.constant 0 : index
    %c0_72 = arith.constant 0 : index
    %255 = vector.load %arg6[%c1_70, %c0_71, %c0_72] : memref<2x128x32xbf16, #tpu.memory_space<vmem>>, vector<1x128x32xbf16>
    %256 = vector.shape_cast %255 : vector<1x128x32xbf16> to vector<128x32xbf16>
    %cst_73 = arith.constant dense<0.000000e+00> : vector<8x32xf32>
    %257 = tpu.matmul %254, %256, %cst_73 {dimension_numbers = #tpu.dot_dimension_numbers<[1], [0], [0], [1], [0, 0, 1, 1], [], []>} : vector<8x128xbf16>, vector<128x32xbf16>, vector<8x32xf32> -> vector<8x32xf32>
    %258 = vector.shape_cast %158 : vector<32xf32> to vector<1x32xf32>
    %259 = vector.broadcast %258 : vector<1x32xf32> to vector<8x32xf32>
    %260 = arith.addf %257, %259 : vector<8x32xf32>
    %261 = arith.addf %260, %233 : vector<8x32xf32>
    %cst_74 = arith.constant dense<0.000000e+00> : vector<8xf32>
    %262 = vector.multi_reduction <add>, %261, %cst_74 [1] : vector<8x32xf32> to vector<8xf32>
    %263 = vector.shape_cast %262 : vector<8xf32> to vector<8x1xf32>
    %cst_75 = arith.constant 3.200000e+01 : f32
    %264 = vector.broadcast %cst_75 : f32 to vector<8x1xf32>
    %265 = arith.divf %263, %264 : vector<8x1xf32>
    %266 = vector.broadcast %265 : vector<8x1xf32> to vector<8x32xf32>
    %267 = arith.subf %261, %266 : vector<8x32xf32>
    %268 = arith.mulf %267, %267 : vector<8x32xf32>
    %cst_76 = arith.constant dense<0.000000e+00> : vector<8xf32>
    %269 = vector.multi_reduction <add>, %268, %cst_76 [1] : vector<8x32xf32> to vector<8xf32>
    %270 = vector.shape_cast %269 : vector<8xf32> to vector<8x1xf32>
    %cst_77 = arith.constant 3.200000e+01 : f32
    %271 = vector.broadcast %cst_77 : f32 to vector<8x1xf32>
    %272 = arith.divf %270, %271 : vector<8x1xf32>
    %273 = vector.broadcast %265 : vector<8x1xf32> to vector<8x32xf32>
    %274 = arith.subf %261, %273 : vector<8x32xf32>
    %cst_78 = arith.constant 1.000000e-07 : f32
    %275 = vector.broadcast %cst_78 : f32 to vector<8x1xf32>
    %276 = arith.addf %272, %275 : vector<8x1xf32>
    %277 = math.rsqrt %276 : vector<8x1xf32>
    %278 = vector.broadcast %277 : vector<8x1xf32> to vector<8x32xf32>
    %279 = arith.mulf %274, %278 : vector<8x32xf32>
    %280 = vector.shape_cast %160 : vector<32xf32> to vector<1x32xf32>
    %281 = vector.broadcast %280 : vector<1x32xf32> to vector<8x32xf32>
    %282 = arith.mulf %279, %281 : vector<8x32xf32>
    %283 = vector.shape_cast %162 : vector<32xf32> to vector<1x32xf32>
    %284 = vector.broadcast %283 : vector<1x32xf32> to vector<8x32xf32>
    %285 = arith.addf %282, %284 : vector<8x32xf32>
    %286 = vector.extract_strided_slice %285 {offsets = [0, 0], sizes = [1, 32], strides = [1, 1]} : vector<8x32xf32> to vector<1x32xf32>
    %287 = arith.truncf %286 : vector<1x32xf32> to vector<1x32xbf16>
    %c0_79 = arith.constant 0 : index
    %c0_80 = arith.constant 0 : index
    %288 = vector.load %arg8[%c0_79, %c0_80] : memref<32x128xbf16, #tpu.memory_space<vmem>>, vector<32x128xbf16>
    %cst_81 = arith.constant dense<0.000000e+00> : vector<1x128xf32>
    %289 = tpu.matmul %287, %288, %cst_81 {dimension_numbers = #tpu.dot_dimension_numbers<[1], [0], [0], [1], [0, 0, 1, 1], [], []>} : vector<1x32xbf16>, vector<32x128xbf16>, vector<1x128xf32> -> vector<1x128xf32>
    %c0_82 = arith.constant 0 : index
    %c0_83 = arith.constant 0 : index
    %290 = vector.load %arg9[%c0_82, %c0_83] : memref<1x128xf32, #tpu.memory_space<vmem>>, vector<1x128xf32>
    %291 = arith.addf %289, %290 : vector<1x128xf32>
    %292 = arith.mulf %291, %291 : vector<1x128xf32>
    %293 = arith.mulf %291, %292 : vector<1x128xf32>
    %cst_84 = arith.constant 4.471500e-02 : f32
    %294 = vector.broadcast %cst_84 : f32 to vector<1x128xf32>
    %295 = arith.mulf %294, %293 : vector<1x128xf32>
    %296 = arith.addf %291, %295 : vector<1x128xf32>
    %cst_85 = arith.constant 0.797884583 : f32
    %297 = vector.broadcast %cst_85 : f32 to vector<1x128xf32>
    %298 = arith.mulf %297, %296 : vector<1x128xf32>
    %299 = math.tanh %298 : vector<1x128xf32>
    %cst_86 = arith.constant 1.000000e+00 : f32
    %300 = vector.broadcast %cst_86 : f32 to vector<1x128xf32>
    %301 = arith.addf %300, %299 : vector<1x128xf32>
    %cst_87 = arith.constant 5.000000e-01 : f32
    %302 = vector.broadcast %cst_87 : f32 to vector<1x128xf32>
    %303 = arith.mulf %302, %301 : vector<1x128xf32>
    %304 = arith.mulf %291, %303 : vector<1x128xf32>
    %305 = vector.shape_cast %304 : vector<1x128xf32> to vector<1x1x128xf32>
    %c0_88 = arith.constant 0 : index
    %c0_89 = arith.constant 0 : index
    %c0_90 = arith.constant 0 : index
    %306 = vector.load %arg10[%c0_88, %c0_89, %c0_90] : memref<1x1x128xf32, #tpu.memory_space<vmem>>, vector<1x1x128xf32>
    tpu.vector_store %arg10[%c0_88, %c0_89, %c0_90], %305 {strides = array<i32>} : memref<1x1x128xf32, #tpu.memory_space<vmem>>, vector<1x1x128xf32>,
    return
  }
  func.func @transform_0(%arg0: i32) -> (i32, i32, i32) {
    %c0_i32 = arith.constant 0 : i32
    %c0_i32_0 = arith.constant 0 : i32
    %c0_i32_1 = arith.constant 0 : i32
    return %arg0, %c0_i32, %c0_i32_0 : i32, i32, i32
  }
  func.func @transform_1(%arg0: i32) -> (i32, i32, i32) {
    %c0_i32 = arith.constant 0 : i32
    %c0_i32_0 = arith.constant 0 : i32
    %c0_i32_1 = arith.constant 0 : i32
    return %arg0, %c0_i32, %c0_i32_0 : i32, i32, i32
  }
  func.func @transform_2(%arg0: i32) -> (i32, i32, i32) {
    %c0_i32 = arith.constant 0 : i32
    %c0_i32_0 = arith.constant 0 : i32
    %c0_i32_1 = arith.constant 0 : i32
    %c0_i32_2 = arith.constant 0 : i32
    return %c0_i32, %c0_i32_0, %c0_i32_1 : i32, i32, i32
  }
  func.func @transform_3(%arg0: i32) -> (i32, i32, i32) {
    %c0_i32 = arith.constant 0 : i32
    %c0_i32_0 = arith.constant 0 : i32
    %c0_i32_1 = arith.constant 0 : i32
    %c0_i32_2 = arith.constant 0 : i32
    return %c0_i32, %c0_i32_0, %c0_i32_1 : i32, i32, i32
  }
  func.func @transform_4(%arg0: i32) -> (i32, i32, i32) {
    %c0_i32 = arith.constant 0 : i32
    %c0_i32_0 = arith.constant 0 : i32
    %c0_i32_1 = arith.constant 0 : i32
    %c0_i32_2 = arith.constant 0 : i32
    return %c0_i32, %c0_i32_0, %c0_i32_1 : i32, i32, i32
  }
  func.func @transform_5(%arg0: i32) -> (i32, i32, i32) {
    %c0_i32 = arith.constant 0 : i32
    %c0_i32_0 = arith.constant 0 : i32
    %c0_i32_1 = arith.constant 0 : i32
    %c0_i32_2 = arith.constant 0 : i32
    return %c0_i32, %c0_i32_0, %c0_i32_1 : i32, i32, i32
  }
  func.func @transform_6(%arg0: i32) -> (i32, i32, i32) {
    %c0_i32 = arith.constant 0 : i32
    %c0_i32_0 = arith.constant 0 : i32
    %c0_i32_1 = arith.constant 0 : i32
    %c0_i32_2 = arith.constant 0 : i32
    return %c0_i32, %c0_i32_0, %c0_i32_1 : i32, i32, i32
  }
  func.func @transform_7(%arg0: i32) -> (i32, i32) {
    %c0_i32 = arith.constant 0 : i32
    %c0_i32_0 = arith.constant 0 : i32
    %c0_i32_1 = arith.constant 0 : i32
    return %c0_i32, %c0_i32_0 : i32, i32
  }
  func.func @transform_8(%arg0: i32) -> (i32, i32) {
    %c0_i32 = arith.constant 0 : i32
    %c0_i32_0 = arith.constant 0 : i32
    %c0_i32_1 = arith.constant 0 : i32
    return %c0_i32, %c0_i32_0 : i32, i32
  }
  func.func @transform_9(%arg0: i32) -> (i32, i32, i32) {
    %c0_i32 = arith.constant 0 : i32
    %c0_i32_0 = arith.constant 0 : i32
    %c0_i32_1 = arith.constant 0 : i32
    return %arg0, %c0_i32, %c0_i32_0 : i32, i32, i32
  }
}

</mosaic_0001>

<bundles_post_ra>
// kernel: tpu_custom_call.1
= control target key start
LH: loop header
LB: loop body
LE: loop exit
PB: predicated region body
PF: predicated region fallthrough
CT: control target
= control target key end

     0   :  { %14 = vsyncpa [#allocation3], 0  ;;  %s4610_s0 = inlined_call_operand.vmem [shape: f32[2,8,32], index: 0, kind: input, shape index: {}]   ;;  %s4611_s1 = inlined_call_operand.vmem [shape: f32[2,1,8], index: 1, kind: input, shape index: {}]   ;;  %s4612_s2 = inlined_call_operand.vmem [shape: bf16[2,32,96], index: 2, kind: input, shape index: {}]   ;;  %s4613_s3 = inlined_call_operand.vmem [shape: bf16[2,32,32], index: 3, kind: input, shape index: {}]   ;;  %s4614_s4 = inlined_call_operand.vmem [shape: bf16[2,32,128], index: 4, kind: input, shape index: {}]   ;;  %s4615_s5 = inlined_call_operand.vmem [shape: bf16[2,128,32], index: 5, kind: input, shape index: {}]   ;;  %s4616_s6 = inlined_call_operand.vmem [shape: f32[2,8,128], index: 6, kind: input, shape index: {}]   ;;  %s4617_s7 = inlined_call_operand.vmem [shape: bf16[32,128], index: 7, kind: input, shape index: {}]   ;;  %s4618_s8 = inlined_call_operand.vmem [shape: f32[1,128], index: 8, kind: input, shape index: {}]   ;;  %s4619_s9 = inlined_call_operand.hbm [shape: f32[2,1,128], index: 9, kind: output, shape index: {}]  }
   0x1   :  { %16 = vsyncpa [#allocation3 + $0x1], 0  ;;  %s3909_s30 = smov 0   ;;  %s3911_s10 = smov 0  }
   0x2   :  { %s3913_s11 = smov 0   ;;  %s3915_s12 = smov 0  }
   0x3 LB: > { %s3930_s13 = sadd.s32 4294967295, %s3844_s12   ;;  %s3285_s14 = sadd.s32 4294967294, %s3844_s12   ;;  %s3844_s12 = sphi %s3915_s12, %s4634_s12   ;;  %s3840_s11 = sphi %s3913_s11, %s4633_s11   ;;  %s3836_s10 = sphi %s3911_s10, %s4632_s10   ;;  %s3832_s30 = sphi %s3909_s30, %s4631_s30  }
   0x4   : > { %s3934_s15 = sadd.s32 1, %s3844_s12   ;;  %s228_s16 = sadd.s32 1, %s3840_s11 }
   0x5   : > { %s225_s17 = ssub.s32 %s3844_s12, %s3934_s15  ;;  %p238_p0 = scmp.ne.s32.totalorder %s3840_s11, %s3836_s10 }
   0x6   : > { %p226_p1 = scmp.eq.s32.totalorder %s225_s17, 0  ;;  %p239_p2 = scmp.eq.s32.totalorder %s3930_s13, 1 }
   0x7   : > { %p244_p3 = scmp.ne.s32.totalorder %s3836_s10, %s3832_s30  ;;  %p245_p4 = scmp.eq.s32.totalorder %s3285_s14, 1 }
   0x8   : > { %s3945_s18 = scalar_select %p226_p1, %s3840_s11, %s228_s16  }
   0x9   : > { %p3947_p5 = por %p239_p2, %p238_p0  ;;  %p3951_p6 = por %p245_p4, %p244_p3 }
   0xa   : > { %p3288_p7 = scmp.ge.s32.totalorder %s3844_s12, 1  ;;  %p297_p8 = scmp.lt.s32.totalorder %s3844_s12, 3 }
   0xc   : > { %p298_p9 = pnand %p3288_p7, %p297_p8 }
   0xd   : > { %v3706_v0 = vld [vmem:[%s4612_s2] sm:$0xff] (!%p298_p9)   ;;  %v3846_v1 = vmov (!%p298_p9), 0.0   ;;  %v3707_v2 = vld [vmem:[%s4612_s2 + $0x8] sm:$0xff] (!%p298_p9)   ;;  %vm3847_vm0 = vmmov (!%p298_p9), 0   ;;  %p334_p10 = scmp.lt.s32.totalorder (!%p298_p9), %s3930_s13, 1  ;;  %vm366_vm1 = vcmask (!%p298_p9), 261120   ;;  %v350_v5 = vlaneseq (!%p298_p9) }
   0xe   : > { %301 = sbr.rel (%p298_p9) target bundleno = 5728 (0x1660), region = 56  ;;  %3463 = vmatprep.subr.bf16.mxu1 (!%p298_p9), %v3846_v1  ;;  %3477 = vmatprep.subr.bf16.mxu0 (!%p298_p9), %v3846_v1  ;;  %v3992_v8 = vld [vmem:[%s4616_s6] sm:$0xff] (!%p298_p9)  ;;  %s3848_s17 = smov (!%p298_p9), 104   ;;  %v3852_v18 = vmov (!%p298_p9), 1983009808   ;;  %vm860_vm2 = vcmask (!%p298_p9), 64512  }
   0xf   : > { %3464 = vmatpush3.bf16.msra.mxu1 (!%p298_p9), %v3706_v0  ;;  %3467 = vmatprep.mubr.msk.bf16.mxu1 (!%p298_p9), %vm3847_vm0, %v3846_v1  ;;  %v3986_v6 = vshrl.u32 (!%p298_p9), %v350_v5, 7  ;;  %s3849_s21 = smov (!%p298_p9), 120   ;;  %s3850_s22 = smov (!%p298_p9), 96   ;;  %v423_v19 = vunpack.c.l.s4 (!%p298_p9), %v3852_v18  ;;  %v3853_v21 = vmov (!%p298_p9), 1934713408   ;;  %vm1114_vm3 = vcmask (!%p298_p9), 1043456  }
  0x10   : > { %3465 = vmatprep.subr.bf16.mxu1 (!%p298_p9), %v3846_v1  ;;  %3479 = vmatprep.mubr.msk.bf16.mxu0 (!%p298_p9), %vm3847_vm0, %v3846_v1  ;;  %s3851_s23 = smov (!%p298_p9), 112   ;;  %v455_v22 = vunpack.c.l.s4 (!%p298_p9), %v3853_v21  ;;  %s4622_s24 = smov (!%p298_p9), 16   ;;  %vm1445_vm4 = vcmask (!%p298_p9), 130048   ;;  %vm1447_vm5 = vcmask (!%p298_p9), 195584  }
  0x11   : > { %v352_v7 = vsub.s32 (!%p298_p9), 0, %v3986_v6  ;;  %v424_v20 = vunpack.c.0.s8 (!%p298_p9), %v423_v19  ;;  %s4629_s28 = smov (!%p298_p9), 8  }
  0x12   : > { %v456_v28 = vunpack.c.0.s8 (!%p298_p9), %v455_v22 }
  0x13   : > { %3466 = vmatpush3.bf16.msra.mxu1 (!%p298_p9), %v3707_v2  ;;  %v353_v9 = vrot.slane (!%p298_p9), %v3992_v8, %v352_v7  ;;  %v4024_v25 = vsub.s32 (!%p298_p9), %v424_v20, %v3986_v6 }
  0x14   : > { %3471 = vmatprep.subr.bf16.mxu1 (!%p298_p9), %v3846_v1  ;;  %v4035_v35 = vsub.s32 (!%p298_p9), %v456_v28, %v3986_v6 }
  0x15   : > { %s3972_s25 = scalar_select %p334_p10, %s3930_s13, 1 }
  0x17   : > { %s3289_s26 = sshll.u32 %s3972_s25, 3  ;;  %s340_s27 = scalar_lea.vmem %s4611_s1, %s3972_s25 }
  0x18   : > { %s337_s29 = scalar_lea.vmem %s4610_s0, %s3289_s26  ;;  %s4623_s25 = smov 64  }
  0x19   : > { %v3979_v3 = vld [vmem:[%s337_s29] sm:$0xff]  ;;  %s4621_s26 = smov 8   ;;  %s4630_s29 = smov 24  }
  0x1a   : > { %v345_v4 = vpack.c.bf16 %v3979_v3, %v3979_v3 }
  0x1c   : > { %3468 = vmatmul.mubr.msk.bf16.vlgmr.msra.gmra.mrb[0].mxu1 %vm366_vm1, %v345_v4 }
  0x1d   : > { %3473 = vmatprep.mubr.msk.bf16.mxu1 %vm3847_vm0, %v3846_v1 }
  0xef   : > { %v404_v10 = vpop.f32.mrb[0].mxu1 }
  0xf0   : > { %v3997_v11 = vadd.f32 %v404_v10, %v353_v9  ;;  %v3469_v12 = vpop.f32.mrb[1].mxu1 }
  0xf1   : > { %v407_v13 = vpop.f32.mrb[2].mxu1 }
  0xf2   : > { %417 = vrot.lane.b32.xlu1 %v3997_v11, %s3848_s17  ;;  %411 = vrot.lane.b32.xlu0 %v3997_v11, %s3849_s21  ;;  %v3470_v14 = vpop.f32.mrb[3].mxu1 }
  0xf6   : > { %556 = vrot.lane.b32.xlu1 %v3997_v11, %s3850_s22  ;;  %414 = vrot.lane.b32.xlu0 %v3997_v11, %s3851_s23 }
 0x164   : > { %v4007_v15 = vpop.permute.xlu0 %411  ;;  %v4011_v16 = vpop.permute.xlu1 %417 }
 0x165   : > { %558 = vrot.lane.b32.xlu0 %v4007_v15, %s3850_s22  ;;  %v436_v26 = vcombine.low %v4007_v15, %v4011_v16  ;;  %v437_v27 = vcombine.high %v4007_v15, %v4011_v16 }
 0x167   : > { %v444_v31 = vrot.slane %v436_v26, %v4024_v25  ;;  %v451_v32 = vrot.slane %v437_v27, %v4024_v25 }
 0x168   : > { %v4013_v17 = vpop.permute.xlu0 %414  ;;  %v557_v33 = vpop.permute.xlu1 %556 }
 0x169   : > { %562 = vrot.lane.b32.xlu0 %v4011_v16, %s3850_s22  ;;  %560 = vrot.lane.b32.xlu1 %v4013_v17, %s3850_s22  ;;  %v420_v23 = vcombine.low %v3997_v11, %v4013_v17  ;;  %v421_v24 = vcombine.high %v3997_v11, %v4013_v17 }
 0x16b   : > { %v428_v29 = vrot.slane %v420_v23, %v4024_v25  ;;  %v435_v30 = vrot.slane %v421_v24, %v4024_v25 }
 0x16d   : > { %v452_v36 = vcombine.low %v428_v29, %v444_v31  ;;  %v453_v37 = vcombine.high %v428_v29, %v444_v31  ;;  %v468_v38 = vcombine.low %v435_v30, %v451_v32  ;;  %v469_v39 = vcombine.high %v435_v30, %v451_v32 }
 0x16f   : > { %v460_v46 = vrot.slane %v452_v36, %v4035_v35  ;;  %v467_v47 = vrot.slane %v453_v37, %v4035_v35  ;;  %v476_v48 = vrot.slane %v468_v38, %v4035_v35  ;;  %v483_v49 = vrot.slane %v469_v39, %v4035_v35 }
 0x171   : > { %v488_v58 = vcombine.low %v460_v46, %v467_v47  ;;  %v3293_v59 = vcombine.high %v460_v46, %v467_v47  ;;  %v504_v60 = vcombine.low %v476_v48, %v483_v49  ;;  %v3294_v61 = vcombine.high %v476_v48, %v483_v49 }
 0x173   : > { %v495_v12 = vrot.slane %v488_v58, %v4024_v25  ;;  %v503_v13 = vrot.slane %v3293_v59, %v4024_v25  ;;  %v511_v14 = vrot.slane %v504_v60, %v4024_v25  ;;  %v519_v18 = vrot.slane %v3294_v61, %v4024_v25  ;;  %v4089_v61 = vld [vmem:[%s340_s27] ss:$0 sm:$0xff]  ;;  %s4620_s27 = smov 24  }
 0x175   : > { %v520_v30 = vcombine.low %v495_v12, %v503_v13  ;;  %v536_v31 = vcombine.low %v511_v14, %v519_v18  ;;  %v537_v48 = vcombine.high %v511_v14, %v519_v18 }
 0x177   : > { %v528_v39 = vrot.slane %v520_v30, %v4035_v35 }
 0x1d7   : > { %v559_v34 = vpop.permute.xlu0 %558 }
 0x1db   : > { %v561_v40 = vpop.permute.xlu1 %560  ;;  %v563_v41 = vpop.permute.xlu0 %562 }
 0x1dc   : > { %v568_v42 = vcombine.low %v557_v33, %v561_v40  ;;  %v569_v43 = vcombine.high %v557_v33, %v561_v40  ;;  %v584_v44 = vcombine.low %v559_v34, %v563_v41  ;;  %v585_v45 = vcombine.high %v559_v34, %v563_v41 }
 0x1dd   : > { %v544_v40 = vrot.slane %v536_v31, %v4035_v35 }
 0x1de   : > { %v576_v50 = vrot.slane %v568_v42, %v4024_v25  ;;  %v583_v51 = vrot.slane %v569_v43, %v4024_v25  ;;  %v592_v52 = vrot.slane %v584_v44, %v4024_v25  ;;  %v599_v53 = vrot.slane %v585_v45, %v4024_v25 }
 0x1df   : > { %v521_v45 = vcombine.high %v495_v12, %v503_v13  ;;  %v552_v46 = vcombine.low %v528_v39, %v544_v40  ;;  %v553_v47 = vcombine.high %v528_v39, %v544_v40 }
 0x1e0   : > { %v600_v54 = vcombine.low %v576_v50, %v592_v52  ;;  %v601_v55 = vcombine.high %v576_v50, %v592_v52  ;;  %v616_v56 = vcombine.low %v583_v51, %v599_v53  ;;  %v617_v57 = vcombine.high %v583_v51, %v599_v53 }
 0x1e1   : > { %v852_v51 = vpack.c.bf16 %v552_v46, %v552_v46  ;;  %v853_v52 = vpack.c.bf16 %v553_v47, %v553_v47  ;;  %v535_v53 = vrot.slane %v521_v45, %v4035_v35 }
 0x1e2   : > { %v608_v62 = vrot.slane %v600_v54, %v4035_v35  ;;  %v615_v63 = vrot.slane %v601_v55, %v4035_v35  ;;  %v624_v0 = vrot.slane %v616_v56, %v4035_v35  ;;  %v631_v2 = vrot.slane %v617_v57, %v4035_v35 }
 0x1e3   : > { %v551_v54 = vrot.slane %v537_v48, %v4035_v35 }
 0x1e4   : > { %v636_v4 = vcombine.low %v608_v62, %v615_v63  ;;  %v3295_v5 = vcombine.high %v608_v62, %v615_v63  ;;  %v652_v9 = vcombine.low %v624_v0, %v631_v2  ;;  %v3296_v10 = vcombine.high %v624_v0, %v631_v2 }
 0x1e5   : > { %v554_v57 = vcombine.low %v535_v53, %v551_v54  ;;  %v555_v58 = vcombine.high %v535_v53, %v551_v54 }
 0x1e6   : > { %v643_v19 = vrot.slane %v636_v4, %v4024_v25  ;;  %v651_v20 = vrot.slane %v3295_v5, %v4024_v25  ;;  %v659_v21 = vrot.slane %v652_v9, %v4024_v25  ;;  %v667_v22 = vrot.slane %v3296_v10, %v4024_v25 }
 0x1e7   : > { %v854_v59 = vpack.c.bf16 %v554_v57, %v554_v57  ;;  %v855_v60 = vpack.c.bf16 %v555_v58, %v555_v58 }
 0x1e8   : > { %v668_v23 = vcombine.low %v643_v19, %v651_v20  ;;  %v684_v24 = vcombine.low %v659_v21, %v667_v22  ;;  %v669_v26 = vcombine.high %v643_v19, %v651_v20  ;;  %v685_v27 = vcombine.high %v659_v21, %v667_v22 }
 0x1ea   : > { %v676_v28 = vrot.slane %v668_v23, %v4035_v35  ;;  %v692_v29 = vrot.slane %v684_v24, %v4035_v35  ;;  %v683_v34 = vrot.slane %v669_v26, %v4035_v35  ;;  %v699_v36 = vrot.slane %v685_v27, %v4035_v35 }
 0x1ec   : > { %v700_v32 = vcombine.low %v676_v28, %v692_v29  ;;  %v701_v33 = vcombine.high %v676_v28, %v692_v29  ;;  %v702_v43 = vcombine.low %v683_v34, %v699_v36  ;;  %v703_v44 = vcombine.high %v683_v34, %v699_v36 }
 0x1ee   : > { %v856_v37 = vpack.c.bf16 %v700_v32, %v700_v32  ;;  %v857_v38 = vpack.c.bf16 %v701_v33, %v701_v33  ;;  %v858_v49 = vpack.c.bf16 %v702_v43, %v702_v43  ;;  %v859_v50 = vpack.c.bf16 %v703_v44, %v703_v44 }
 0x1f0   : > { %v865_v41 = vsel %vm860_vm2, %v856_v37, 0  ;;  %v911_v42 = vsel %vm860_vm2, %v857_v38, 0  ;;  %v957_v55 = vsel %vm860_vm2, %v858_v49, 0  ;;  %v1003_v56 = vsel %vm860_vm2, %v859_v50, 0 }
 0x1f1   : > { %3472 = vmatpush3.bf16.xpose.msra.mxu1 %v865_v41  ;;  %3478 = vmatpush3.bf16.xpose.msra.mxu0 %v911_v42 }
 0x1f2   : > { %3483 = vmatprep.subr.bf16.mxu1 %v3846_v1  ;;  %3489 = vmatprep.subr.bf16.mxu0 %v3846_v1 }
 0x1f8   : > { %3474 = vmatmul.mubr.msk.bf16.vlgmr.msra.gmra.mrb[4].mxu1 %vm860_vm2, %v852_v51  ;;  %3480 = vmatmul.mubr.msk.bf16.vlgmr.msra.gmra.mrb[0].mxu0 %vm860_vm2, %v853_v52 }
 0x1f9   : > { %3484 = vmatpush3.bf16.xpose.msra.mxu1 %v957_v55  ;;  %3490 = vmatpush3.bf16.xpose.msra.mxu0 %v1003_v56 }
 0x1fa   : > { %3485 = vmatprep.mubr.msk.bf16.mxu1 %vm3847_vm0, %v3846_v1  ;;  %3491 = vmatprep.mubr.msk.bf16.mxu0 %vm3847_vm0, %v3846_v1 }
 0x1fb   : > { %3495 = vmatprep.subr.bf16.mxu1 %v3846_v1  ;;  %3501 = vmatprep.subr.bf16.mxu0 %v3846_v1 }
 0x200   : > { %3486 = vmatmul.mubr.msk.bf16.vlgmr.msra.gmra.mrb[8].mxu1 %vm860_vm2, %v854_v59  ;;  %3492 = vmatmul.mubr.msk.bf16.vlgmr.msra.gmra.mrb[4].mxu0 %vm860_vm2, %v855_v60 }
 0x201   : > { %3497 = vmatprep.mubr.msk.bf16.mxu1 %vm3847_vm0, %v3846_v1  ;;  %3503 = vmatprep.mubr.msk.bf16.mxu0 %vm3847_vm0, %v3846_v1 }
 0x2cb   : > { %v901_v62 = vpop.f32.mrb[4].mxu1  ;;  %v947_v63 = vpop.f32.mrb[0].mxu0 }
 0x2cc   : > { %v1045_v0 = vmul.f32 0.35355338, %v901_v62  ;;  %v1046_v2 = vmul.f32 0.35355338, %v947_v63  ;;  %v3475_v4 = vpop.f32.mrb[5].mxu1  ;;  %v3481_v5 = vpop.f32.mrb[1].mxu0 }
 0x2cd   : > { %v904_v9 = vpop.f32.mrb[6].mxu1  ;;  %v950_v10 = vpop.f32.mrb[2].mxu0 }
 0x2ce   : > { %v3476_v12 = vpop.f32.mrb[7].mxu1  ;;  %v3482_v13 = vpop.f32.mrb[3].mxu0  ;;  %v1056_v14 = vadd.f32 %v4089_v61, %v1046_v2  ;;  %v1055_v18 = vadd.f32 %v4089_v61, %v1045_v0 }
 0x2d0   : > { %v1062_v19 = vsel %vm860_vm2, %v1056_v14, -inf  ;;  %v1059_v20 = vsel %vm860_vm2, %v1055_v18, -inf }
 0x2d1   : > { %1063 = vmax.xlane.f32.xlu0 %v1062_v19  ;;  %1060 = vmax.xlane.f32.xlu1 %v1059_v20 }
 0x2d3   : > { %v993_v21 = vpop.f32.mrb[8].mxu1  ;;  %v1039_v22 = vpop.f32.mrb[4].mxu0 }
 0x2d4   : > { %v1047_v23 = vmul.f32 0.35355338, %v993_v21  ;;  %v1048_v24 = vmul.f32 0.35355338, %v1039_v22  ;;  %v3487_v26 = vpop.f32.mrb[9].mxu1  ;;  %v3493_v27 = vpop.f32.mrb[5].mxu0 }
 0x2d5   : > { %v996_v28 = vpop.f32.mrb[10].mxu1  ;;  %v1042_v29 = vpop.f32.mrb[6].mxu0 }
 0x2d6   : > { %v3488_v30 = vpop.f32.mrb[11].mxu1  ;;  %v3494_v31 = vpop.f32.mrb[7].mxu0  ;;  %v1058_v32 = vadd.f32 %v4089_v61, %v1048_v24  ;;  %v1057_v33 = vadd.f32 %v4089_v61, %v1047_v23 }
 0x2d8   : > { %v1068_v34 = vsel %vm860_vm2, %v1058_v32, -inf  ;;  %v1065_v36 = vsel %vm860_vm2, %v1057_v33, -inf }
 0x2d9   : > { %1069 = vmax.xlane.f32.xlu1 %v1068_v34  ;;  %1066 = vmax.xlane.f32.xlu0 %v1065_v36 }
 0x2ea   : > { %706 = vrot.lane.b32.xlu1 %v4007_v15, %s4623_s25 }
 0x2ef   : > { %704 = vrot.lane.b32.xlu0 %v3997_v11, %s4623_s25 }
 0x35e   : > { %v1064_v37 = vpop.xlane.xlu0 %1063  ;;  %v1061_v38 = vpop.xlane.xlu1 %1060 }
 0x35f   : > { %v1072_v39 = vsub.f32 %v1056_v14, %v1064_v37  ;;  %v1071_v40 = vsub.f32 %v1055_v18, %v1061_v38 }
 0x361   : > { %v1077_v41 = vmul.f32 1.442695, %v1072_v39  ;;  %v1075_v42 = vmul.f32 1.442695, %v1071_v40 }
 0x363   : > { %3736 = vpow2.f32 %v1077_v41 }
 0x364   : > { %3738 = vpow2.f32 %v1075_v42 }
 0x366   : > { %v1067_v11 = vpop.xlane.xlu0 %1066  ;;  %v1070_v46 = vpop.xlane.xlu1 %1069 }
 0x367   : > { %v1073_v47 = vsub.f32 %v1057_v33, %v1067_v11  ;;  %v1074_v48 = vsub.f32 %v1058_v32, %v1070_v46 }
 0x369   : > { %v1079_v49 = vmul.f32 1.442695, %v1073_v47  ;;  %v1081_v50 = vmul.f32 1.442695, %v1074_v48 }
 0x36a   : > { %v705_v54 = vpop.permute.xlu0 %704 }
 0x36b   : > { %3740 = vpow2.f32 %v1079_v49 }
 0x36c   : > { %3742 = vpow2.f32 %v1081_v50 }
 0x36d   : > { %v4103_v43 = vpop.eup %3736 }
 0x36e   : > { %v4105_v44 = vpop.eup %3738  ;;  %v1086_v45 = vsel %vm860_vm2, %v4103_v43, 0.0 }
 0x36f   : > { %1087 = vadd.xlane.f32.xlu1 %v1086_v45  ;;  %v1083_v15 = vsel %vm860_vm2, %v4105_v44, 0.0 }
 0x370   : > { %1084 = vadd.xlane.f32.xlu0 %v1083_v15 }
 0x375   : > { %v4115_v51 = vpop.eup %3740 }
 0x376   : > { %v4117_v52 = vpop.eup %3742  ;;  %v1089_v53 = vsel %vm860_vm2, %v4115_v51, 0.0 }
 0x380   : > { %708 = vrot.lane.b32.xlu1 %v4013_v17, %s4623_s25  ;;  %v1092_v17 = vsel %vm860_vm2, %v4117_v52, 0.0 }
 0x386   : > { %710 = vrot.lane.b32.xlu0 %v4011_v16, %s4623_s25  ;;  %v707_v16 = vpop.permute.xlu1 %706  ;;  %s4628_s25 = smov 16  }
 0x3a4   : > { %1090 = vadd.xlane.f32.xlu1 %v1089_v53 }
 0x3a5   : > { %1093 = vadd.xlane.f32.xlu0 %v1092_v17 }
 0x3fc   : > { %v1088_v55 = vpop.xlane.xlu1 %1087 }
 0x3fd   : > { %v1085_v56 = vpop.xlane.xlu0 %1084  ;;  %3744 = vrcp.f32 %v1088_v55 }
 0x3fe   : > { %3746 = vrcp.f32 %v1085_v56 }
 0x400   : > { %v709_v57 = vpop.permute.xlu1 %708 }
 0x401   : > { %v716_v58 = vcombine.low %v705_v54, %v709_v57  ;;  %v717_v59 = vcombine.high %v705_v54, %v709_v57  ;;  %v711_v60 = vpop.permute.xlu0 %710 }
 0x402   : > { %v732_v62 = vcombine.low %v707_v16, %v711_v60  ;;  %v733_v63 = vcombine.high %v707_v16, %v711_v60 }
 0x403   : > { %v724_v0 = vrot.slane %v716_v58, %v4024_v25  ;;  %v731_v2 = vrot.slane %v717_v59, %v4024_v25 }
 0x404   : > { %v740_v4 = vrot.slane %v732_v62, %v4024_v25  ;;  %v747_v5 = vrot.slane %v733_v63, %v4024_v25 }
 0x406   : > { %v748_v9 = vcombine.low %v724_v0, %v740_v4  ;;  %v749_v10 = vcombine.high %v724_v0, %v740_v4  ;;  %v764_v12 = vcombine.low %v731_v2, %v747_v5  ;;  %v765_v13 = vcombine.high %v731_v2, %v747_v5 }
 0x407   : > { %v3745_v37 = vpop.eup %3744 }
 0x408   : > { %v756_v14 = vrot.slane %v748_v9, %v4035_v35  ;;  %v763_v18 = vrot.slane %v749_v10, %v4035_v35  ;;  %v772_v19 = vrot.slane %v764_v12, %v4035_v35  ;;  %v779_v20 = vrot.slane %v765_v13, %v4035_v35  ;;  %v3747_v40 = vpop.eup %3746 }
 0x409   : > { %v1100_v11 = vmul.f32 %v3745_v37, %v4103_v43  ;;  %v1099_v46 = vmul.f32 %v3747_v40, %v4105_v44  ;;  %v3708_v37 = vld [vmem:[%s4613_s3] sm:$0xff]  }
 0x40a   : > { %v784_v21 = vcombine.low %v756_v14, %v763_v18  ;;  %v3297_v22 = vcombine.high %v756_v14, %v763_v18  ;;  %v800_v23 = vcombine.low %v772_v19, %v779_v20  ;;  %v3298_v24 = vcombine.high %v772_v19, %v779_v20 }
 0x40b   : > { %v1103_v16 = vpack.c.bf16 %v1099_v46, %v1099_v46  ;;  %v1104_v54 = vpack.c.bf16 %v1100_v11, %v1100_v11  ;;  %v3709_v46 = vld [vmem:[%s4613_s3 + $0x8] sm:$0xff]  }
 0x40c   : > { %v791_v26 = vrot.slane %v784_v21, %v4024_v25  ;;  %v799_v27 = vrot.slane %v3297_v22, %v4024_v25  ;;  %v807_v28 = vrot.slane %v800_v23, %v4024_v25  ;;  %v815_v29 = vrot.slane %v3298_v24, %v4024_v25 }
 0x40e   : > { %v816_v30 = vcombine.low %v791_v26, %v799_v27  ;;  %v817_v31 = vcombine.high %v791_v26, %v799_v27  ;;  %v832_v32 = vcombine.low %v807_v28, %v815_v29  ;;  %v833_v33 = vcombine.high %v807_v28, %v815_v29 }
 0x410   : > { %v824_v34 = vrot.slane %v816_v30, %v4035_v35  ;;  %v831_v36 = vrot.slane %v817_v31, %v4035_v35  ;;  %v840_v38 = vrot.slane %v832_v32, %v4035_v35  ;;  %v847_v39 = vrot.slane %v833_v33, %v4035_v35 }
 0x412   : > { %v848_v41 = vcombine.low %v824_v34, %v840_v38  ;;  %v849_v42 = vcombine.high %v824_v34, %v840_v38  ;;  %v850_v45 = vcombine.low %v831_v36, %v847_v39  ;;  %v851_v15 = vcombine.high %v831_v36, %v847_v39 }
 0x414   : > { %v1107_v47 = vpack.c.bf16 %v848_v41, %v848_v41  ;;  %v1108_v48 = vpack.c.bf16 %v849_v42, %v849_v42  ;;  %v1109_v53 = vpack.c.bf16 %v850_v45, %v850_v45  ;;  %v1110_v17 = vpack.c.bf16 %v851_v15, %v851_v15 }
 0x416   : > { %v1116_v49 = vsel %vm1114_vm3, %v1107_v47, 0  ;;  %v1162_v50 = vsel %vm1114_vm3, %v1108_v48, 0  ;;  %v1208_v43 = vsel %vm1114_vm3, %v1109_v53, 0  ;;  %v1254_v44 = vsel %vm1114_vm3, %v1110_v17, 0 }
 0x417   : > { %3496 = vmatpush3.bf16.msra.mxu1 %v1116_v49  ;;  %3502 = vmatpush3.bf16.msra.mxu0 %v1162_v50 }
 0x418   : > { %3507 = vmatprep.subr.bf16.mxu1 %v3846_v1  ;;  %3513 = vmatprep.subr.bf16.mxu0 %v3846_v1 }
 0x41a   : > { %3498 = vmatmul.mubr.msk.bf16.vlgmr.msra.gmra.mrb[12].mxu1 %vm860_vm2, %v1103_v16  ;;  %3504 = vmatmul.mubr.msk.bf16.vlgmr.msra.gmra.mrb[8].mxu0 %vm860_vm2, %v1104_v54 }
 0x41b   : > { %3508 = vmatpush3.bf16.msra.mxu1 %v1208_v43  ;;  %3514 = vmatpush3.bf16.msra.mxu0 %v1254_v44 }
 0x41c   : > { %3509 = vmatprep.mubr.msk.bf16.mxu1 %vm3847_vm0, %v3846_v1  ;;  %3515 = vmatprep.mubr.msk.bf16.mxu0 %vm3847_vm0, %v3846_v1 }
 0x41d   : > { %3519 = vmatprep.subr.bf16.mxu1 %v3846_v1  ;;  %3527 = vmatprep.subr.bf16.mxu0 %v3846_v1 }
 0x431   : > { %v1091_v55 = vpop.xlane.xlu1 %1090 }
 0x432   : > { %3748 = vrcp.f32 %v1091_v55  ;;  %v1094_v56 = vpop.xlane.xlu0 %1093 }
 0x433   : > { %3750 = vrcp.f32 %v1094_v56 }
 0x43c   : > { %v3749_v57 = vpop.eup %3748 }
 0x43d   : > { %v3751_v58 = vpop.eup %3750  ;;  %v1101_v59 = vmul.f32 %v3749_v57, %v4115_v51 }
 0x43e   : > { %v1102_v60 = vmul.f32 %v3751_v58, %v4117_v52 }
 0x43f   : > { %v1105_v62 = vpack.c.bf16 %v1101_v59, %v1101_v59 }
 0x440   : > { %v1106_v63 = vpack.c.bf16 %v1102_v60, %v1102_v60 }
 0x441   : > { %3510 = vmatmul.mubr.msk.bf16.vlgmr.msra.gmra.mrb[16].mxu1 %vm860_vm2, %v1105_v62 }
 0x442   : > { %3516 = vmatmul.mubr.msk.bf16.vlgmr.msra.gmra.mrb[12].mxu0 %vm860_vm2, %v1106_v63  ;;  %3523 = vmatprep.mubr.msk.bf16.mxu1 %vm3847_vm0, %v3846_v1 }
 0x443   : > { %3531 = vmatprep.mubr.msk.bf16.mxu0 %vm3847_vm0, %v3846_v1  ;;  %3520 = vmatpush3.bf16.msra.mxu1 %v3708_v37 }
 0x444   : > { %3521 = vmatprep.subr.bf16.mxu1 %v3846_v1 }
 0x447   : > { %3522 = vmatpush3.bf16.msra.mxu1 %v3709_v46  ;;  %v3717_v46 = vld [vmem:[%s4615_s5 + $0x28] sm:$0xff]  }
 0x448   : > { %3535 = vmatprep.subr.bf16.mxu1 %v3846_v1 }
 0x4ed   : > { %v1152_v0 = vpop.f32.mrb[12].mxu1  ;;  %v1198_v2 = vpop.f32.mrb[8].mxu0 }
 0x4ee   : > { %v3499_v4 = vpop.f32.mrb[13].mxu1  ;;  %v3505_v5 = vpop.f32.mrb[9].mxu0 }
 0x4ef   : > { %v1155_v9 = vpop.f32.mrb[14].mxu1  ;;  %v1201_v51 = vpop.f32.mrb[10].mxu0 }
 0x4f0   : > { %v3500_v10 = vpop.f32.mrb[15].mxu1  ;;  %v3506_v52 = vpop.f32.mrb[11].mxu0  ;;  %v1456_v51 = vsub.s32 1, %v3986_v6 }
 0x4f2   : > { %v1457_v10 = vrot.slane %v3992_v8, %v1456_v51 }
 0x514   : > { %v1244_v12 = vpop.f32.mrb[16].mxu1 }
 0x515   : > { %v1296_v13 = vcombine.low %v1152_v0, %v1244_v12  ;;  %v1297_v14 = vcombine.high %v1152_v0, %v1244_v12  ;;  %v1290_v18 = vpop.f32.mrb[12].mxu0  ;;  %v3511_v19 = vpop.f32.mrb[17].mxu1 }
 0x516   : > { %v1312_v20 = vcombine.low %v1198_v2, %v1290_v18  ;;  %v1313_v21 = vcombine.high %v1198_v2, %v1290_v18  ;;  %v3517_v22 = vpop.f32.mrb[13].mxu0  ;;  %v1247_v23 = vpop.f32.mrb[18].mxu1 }
 0x517   : > { %v1304_v24 = vrot.slane %v1296_v13, %v4024_v25  ;;  %v1311_v26 = vrot.slane %v1297_v14, %v4024_v25  ;;  %v1293_v27 = vpop.f32.mrb[14].mxu0  ;;  %v3512_v28 = vpop.f32.mrb[19].mxu1 }
 0x518   : > { %v1320_v29 = vrot.slane %v1312_v20, %v4024_v25  ;;  %v1327_v30 = vrot.slane %v1313_v21, %v4024_v25  ;;  %v3518_v31 = vpop.f32.mrb[15].mxu0  ;;  %v3710_v27 = vld [vmem:[%s4614_s4] sm:$0xff]   ;;  %v3711_v28 = vld [vmem:[%s4614_s4 + $0x8] sm:$0xff]  }
 0x519   : > { %3528 = vmatpush3.bf16.msra.mxu0 %v3710_v27  ;;  %v1530_v31 = vsub.s32 2, %v3986_v6 }
 0x51a   : > { %v1328_v32 = vcombine.low %v1304_v24, %v1320_v29  ;;  %v1329_v33 = vcombine.high %v1304_v24, %v1320_v29  ;;  %v1344_v34 = vcombine.low %v1311_v26, %v1327_v30  ;;  %v1345_v36 = vcombine.high %v1311_v26, %v1327_v30  ;;  %3529 = vmatprep.subr.bf16.mxu0 %v3846_v1 }
 0x51c   : > { %v1336_v38 = vrot.slane %v1328_v32, %v4035_v35  ;;  %v1343_v39 = vrot.slane %v1329_v33, %v4035_v35  ;;  %v1352_v40 = vrot.slane %v1344_v34, %v4035_v35  ;;  %v1359_v41 = vrot.slane %v1345_v36, %v4035_v35 }
 0x51d   : > { %3530 = vmatpush3.bf16.msra.mxu0 %v3711_v28  ;;  %v1535_v32 = vsub.s32 3, %v3986_v6  ;;  %v1531_v33 = vrot.slane %v3992_v8, %v1530_v31 }
 0x51e   : > { %v1364_v42 = vcombine.low %v1336_v38, %v1343_v39  ;;  %v3308_v45 = vcombine.high %v1336_v38, %v1343_v39  ;;  %v1380_v15 = vcombine.low %v1352_v40, %v1359_v41  ;;  %v3309_v11 = vcombine.high %v1352_v40, %v1359_v41  ;;  %3555 = vmatprep.subr.bf16.mxu0 %v3846_v1  ;;  %v3712_v41 = vld [vmem:[%s4615_s5] sm:$0xff]  }
 0x51f   : > { %v1536_v37 = vrot.slane %v3992_v8, %v1535_v32 }
 0x520   : > { %v1371_v47 = vrot.slane %v1364_v42, %v4024_v25  ;;  %v1379_v48 = vrot.slane %v3308_v45, %v4024_v25  ;;  %v1387_v49 = vrot.slane %v1380_v15, %v4024_v25  ;;  %v1395_v50 = vrot.slane %v3309_v11, %v4024_v25  ;;  %v3713_v42 = vld [vmem:[%s4615_s5 + $0x8] sm:$0xff]   ;;  %v3714_v45 = vld [vmem:[%s4615_s5 + $0x10] sm:$0xff]   ;;  %v3715_v15 = vld [vmem:[%s4615_s5 + $0x18] sm:$0xff]  }
 0x521   : > { %v3716_v11 = vld [vmem:[%s4615_s5 + $0x20] sm:$0xff]  }
 0x522   : > { %v1397_v53 = vcombine.high %v1371_v47, %v1379_v48  ;;  %v1413_v17 = vcombine.high %v1387_v49, %v1395_v50  ;;  %v1396_v16 = vcombine.low %v1371_v47, %v1379_v48  ;;  %v1412_v54 = vcombine.low %v1387_v49, %v1395_v50  ;;  %v3718_v47 = vld [vmem:[%s4615_s5 + $0x30] sm:$0xff]   ;;  %v3719_v48 = vld [vmem:[%s4615_s5 + $0x38] sm:$0xff]  }
 0x523   : > { %v1545_v49 = vsub.s32 4, %v3986_v6 }
 0x524   : > { %v1411_v43 = vrot.slane %v1397_v53, %v4035_v35  ;;  %v1427_v44 = vrot.slane %v1413_v17, %v4035_v35  ;;  %v1404_v55 = vrot.slane %v1396_v16, %v4035_v35  ;;  %v1420_v56 = vrot.slane %v1412_v54, %v4035_v35 }
 0x525   : > { %v1546_v50 = vrot.slane %v3992_v8, %v1545_v49 }
 0x526   : > { %v1430_v57 = vcombine.low %v1411_v43, %v1427_v44  ;;  %v1429_v58 = vcombine.high %v1404_v55, %v1420_v56  ;;  %v1431_v59 = vcombine.high %v1411_v43, %v1427_v44  ;;  %v1428_v60 = vcombine.low %v1404_v55, %v1420_v56 }
 0x528   : > { %1437 = vrot.lane.b32.xlu1 %v1430_v57, %s4622_s24  ;;  %1433 = vrot.lane.b32.xlu0 %v1429_v58, %s4621_s26  ;;  %s332_s26 = sand.u32 1, %s3836_s10  }
 0x52c   : > { %1441 = vrot.lane.b32.xlu1 %v1431_v59, %s4620_s27  ;;  %s3389_s27 = sshll.u32 %s3930_s13, 4  ;;  %s3858_s13 = smov [#allocation2]  }
 0x52d   : > { %s4568_s24 = scalar_lea.hbm %s4619_s9, %s3389_s27 }
 0x59a   : > { %v1438_v62 = vpop.permute.xlu1 %1437  ;;  %v1434_v63 = vpop.permute.xlu0 %1433 }
 0x59b   : > { %v1444_v0 = vsel %vm860_vm2, %v1428_v60, %v1434_v63 }
 0x59c   : > { %v1446_v4 = vsel %vm1445_vm4, %v1444_v0, %v1438_v62 }
 0x59e   : > { %v1442_v2 = vpop.permute.xlu1 %1441 }
 0x59f   : > { %v1448_v5 = vsel %vm1447_vm5, %v1446_v4, %v1442_v2  ;;  %v1630_v2 = vsub.s32 5, %v3986_v6 }
 0x5a0   : > { %v1449_v9 = vpack.c.bf16 %v1448_v5, %v1448_v5 }
 0x5a1   : > { %v1631_v4 = vrot.slane %v3992_v8, %v1630_v2 }
 0x5a2   : > { %3524 = vmatmul.mubr.msk.bf16.vlgmr.msra.gmra.mrb[20].mxu1 %vm366_vm1, %v1449_v9 }
 0x5a3   : > { %3551 = vmatprep.mubr.msk.bf16.mxu1 %vm3847_vm0, %v3846_v1  ;;  %3536 = vmatpush3.bf16.msra.mxu1 %v3712_v41 }
 0x5a4   : > { %3537 = vmatprep.subr.bf16.mxu1 %v3846_v1 }
 0x5a7   : > { %3538 = vmatpush3.bf16.msra.mxu1 %v3713_v42 }
 0x5a8   : > { %3539 = vmatprep.subr.bf16.mxu1 %v3846_v1 }
 0x5ab   : > { %3540 = vmatpush3.bf16.msra.mxu1 %v3714_v45 }
 0x5ac   : > { %3541 = vmatprep.subr.bf16.mxu1 %v3846_v1 }
 0x5af   : > { %3542 = vmatpush3.bf16.msra.mxu1 %v3715_v15 }
 0x5b0   : > { %3543 = vmatprep.subr.bf16.mxu1 %v3846_v1 }
 0x5b3   : > { %3544 = vmatpush3.bf16.msra.mxu1 %v3716_v11 }
 0x5b4   : > { %3545 = vmatprep.subr.bf16.mxu1 %v3846_v1 }
 0x5b7   : > { %3546 = vmatpush3.bf16.msra.mxu1 %v3717_v46 }
 0x5b8   : > { %3547 = vmatprep.subr.bf16.mxu1 %v3846_v1 }
 0x5bb   : > { %3548 = vmatpush3.bf16.msra.mxu1 %v3718_v47 }
 0x5bc   : > { %3549 = vmatprep.subr.bf16.mxu1 %v3846_v1 }
 0x5bf   : > { %3550 = vmatpush3.bf16.msra.mxu1 %v3719_v48 }
 0x5c0   : > { %3581 = vmatprep.subr.bf16.mxu1 %v3846_v1 }
 0x675   : > { %v1507_v52 = vpop.f32.mrb[20].mxu1 }
 0x676   : > { %v1508_v12 = vadd.f32 %v1507_v52, %v1457_v10  ;;  %v3525_v13 = vpop.f32.mrb[21].mxu1 }
 0x677   : > { %v1510_v14 = vpop.f32.mrb[22].mxu1 }
 0x678   : > { %v3526_v18 = vpop.f32.mrb[23].mxu1  ;;  %v1513_v19 = vadd.f32 %v1508_v12, %v3979_v3 }
 0x67a   : > { %v1514_v20 = vsel %vm366_vm1, %v1513_v19, 0.0 }
 0x67b   : > { %1515 = vadd.xlane.f32.xlu0 %v1514_v20 }
 0x708   : > { %v1516_v21 = vpop.xlane.xlu0 %1515 }
 0x709   : > { %v1518_v22 = vmul.f32 0.03125, %v1516_v21 }
 0x70b   : > { %v1519_v23 = vsub.f32 %v1513_v19, %v1518_v22 }
 0x70d   : > { %v1520_v24 = vmul.f32 %v1519_v23, %v1519_v23 }
 0x70f   : > { %v1521_v26 = vsel %vm366_vm1, %v1520_v24, 0.0  ;;  %v3721_v24 = vld [vmem:[%s4612_s2 + $0x18] sm:$0xff]  }
 0x710   : > { %1522 = vadd.xlane.f32.xlu1 %v1521_v26 }
 0x79d   : > { %v1523_v3 = vpop.xlane.xlu1 %1522 }
 0x79e   : > { %v1524_v29 = vmul.f32 0.03125, %v1523_v3  ;;  %v1736_v3 = vsub.s32 6, %v3986_v6 }
 0x7a0   : > { %v1525_v30 = vadd.f32 1e-07, %v1524_v29  ;;  %v1741_v29 = vsub.s32 7, %v3986_v6 }
 0x7a2   : > { %3752 = vrsqrt.f32 %v1525_v30  ;;  %v1737_v30 = vrot.slane %v3992_v8, %v1736_v3 }
 0x7ac   : > { %v3753_v34 = vpop.eup %3752 }
 0x7ad   : > { %v1527_v36 = vmul.f32 %v3753_v34, %v1519_v23  ;;  %v3720_v23 = vld [vmem:[%s4612_s2 + $0x10] sm:$0xff]  }
 0x7af   : > { %v1532_v38 = vmul.f32 %v1531_v33, %v1527_v36  ;;  %v1742_v36 = vrot.slane %v3992_v8, %v1741_v29 }
 0x7b1   : > { %v1537_v39 = vadd.f32 %v1536_v37, %v1532_v38 }
 0x7b3   : > { %v1538_v40 = vpack.c.bf16 %v1537_v39, %v1537_v39 }
 0x7b5   : > { %3532 = vmatmul.mubr.msk.bf16.vlgmr.msra.gmra.mrb[16].mxu0 %vm366_vm1, %v1538_v40  ;;  %v4292_v40 = vld [vmem:[%s4616_s6 + $0x8] sm:$0xff] }
 0x7b6   : > { %3559 = vmatprep.mubr.msk.bf16.mxu0 %vm3847_vm0, %v3846_v1  ;;  %3556 = vmatpush3.bf16.msra.mxu0 %v3720_v23  ;;  %v1755_v8 = vrot.slane %v4292_v40, %v352_v7 }
 0x7b7   : > { %3557 = vmatprep.subr.bf16.mxu0 %v3846_v1 }
 0x7ba   : > { %3558 = vmatpush3.bf16.msra.mxu0 %v3721_v24 }
 0x7bb   : > { %3563 = vmatprep.subr.bf16.mxu0 %v3846_v1 }
 0x888   : > { %v1596_v53 = vpop.f32.mrb[16].mxu0 }
 0x889   : > { %v1597_v17 = vadd.f32 %v1596_v53, %v1546_v50  ;;  %v3533_v16 = vpop.f32.mrb[17].mxu0 }
 0x88a   : > { %v1599_v54 = vpop.f32.mrb[18].mxu0 }
 0x88b   : > { %v1602_v43 = vmul.f32 %v1597_v17, %v1597_v17  ;;  %v3534_v44 = vpop.f32.mrb[19].mxu0 }
 0x88d   : > { %v1603_v55 = vmul.f32 %v1602_v43, %v1597_v17 }
 0x88f   : > { %v1604_v56 = vmul.f32 0.044715, %v1603_v55 }
 0x891   : > { %v1605_v57 = vadd.f32 %v1604_v56, %v1597_v17 }
 0x893   : > { %v1606_v58 = vmul.f32 0.7978846, %v1605_v57 }
 0x895   : > { %3754 = vtanh.f32 %v1606_v58 }
 0x89f   : > { %v3755_v59 = vpop.eup %3754 }
 0x8a0   : > { %v1608_v60 = vadd.f32 1.0, %v3755_v59 }
 0x8a2   : > { %v1609_v62 = vmul.f32 0.5, %v1608_v60 }
 0x8a4   : > { %v1610_v63 = vmul.f32 %v1609_v62, %v1597_v17 }
 0x8a6   : > { %v1611_v0 = vpack.c.bf16 %v1610_v63, %v1610_v63 }
 0x8a8   : > { %3552 = vmatmul.mubr.bf16.vlgmr.msra.gmra.mrb[24].mxu1 %v1611_v0 }
 0x8a9   : > { %3583 = vmatprep.mubr.msk.bf16.mxu1 %vm3847_vm0, %v3846_v1 }
 0x97b   : > { %v1714_v5 = vpop.f32.mrb[24].mxu1 }
 0x97c   : > { %v1715_v9 = vadd.f32 %v1714_v5, %v1631_v4  ;;  %v3553_v10 = vpop.f32.mrb[25].mxu1 }
 0x97d   : > { %v1717_v52 = vpop.f32.mrb[26].mxu1 }
 0x97e   : > { %v3554_v12 = vpop.f32.mrb[27].mxu1  ;;  %v1720_v13 = vadd.f32 %v1715_v9, %v1537_v39 }
 0x980   : > { %v1721_v14 = vsel %vm366_vm1, %v1720_v13, 0.0 }
 0x981   : > { %1722 = vadd.xlane.f32.xlu0 %v1721_v14 }
 0xa0e   : > { %v1723_v18 = vpop.xlane.xlu0 %1722 }
 0xa0f   : > { %v1724_v19 = vmul.f32 0.03125, %v1723_v18 }
 0xa11   : > { %v1725_v20 = vsub.f32 %v1720_v13, %v1724_v19 }
 0xa13   : > { %v1726_v21 = vmul.f32 %v1725_v20, %v1725_v20 }
 0xa15   : > { %v1727_v22 = vsel %vm366_vm1, %v1726_v21, 0.0 }
 0xa16   : > { %1728 = vadd.xlane.f32.xlu0 %v1727_v22 }
 0xaa3   : > { %v1729_v26 = vpop.xlane.xlu0 %1728 }
 0xaa4   : > { %v1730_v27 = vmul.f32 0.03125, %v1729_v26 }
 0xaa6   : > { %v1731_v28 = vadd.f32 1e-07, %v1730_v27 }
 0xaa8   : > { %3756 = vrsqrt.f32 %v1731_v28 }
 0xab2   : > { %v3757_v33 = vpop.eup %3756 }
 0xab3   : > { %v1733_v34 = vmul.f32 %v3757_v33, %v1725_v20 }
 0xab5   : > { %v1738_v37 = vmul.f32 %v1737_v30, %v1733_v34 }
 0xab7   : > { %v4282_v38 = vadd.f32 %v1742_v36, %v1738_v37 }
 0xab9   : > { %v1746_v39 = vpack.c.bf16 %v4282_v38, %v4282_v38 }
 0xabb   : > { %3560 = vmatmul.mubr.msk.bf16.vlgmr.msra.gmra.mrb[20].mxu0 %vm366_vm1, %v1746_v39 }
 0xabc   : > { %3565 = vmatprep.mubr.msk.bf16.mxu0 %vm3847_vm0, %v3846_v1 }
 0xb8e   : > { %v1805_v41 = vpop.f32.mrb[20].mxu0 }
 0xb8f   : > { %v4297_v42 = vadd.f32 %v1805_v41, %v1755_v8  ;;  %v3561_v45 = vpop.f32.mrb[21].mxu0 }
 0xb90   : > { %v1808_v15 = vpop.f32.mrb[22].mxu0 }
 0xb91   : > { %1815 = vrot.lane.b32.xlu0 %v4297_v42, %s3851_s23  ;;  %1812 = vrot.lane.b32.xlu1 %v4297_v42, %s3849_s21  ;;  %v3562_v11 = vpop.f32.mrb[23].mxu0 }
 0xb95   : > { %1818 = vrot.lane.b32.xlu1 %v4297_v42, %s3848_s17  ;;  %s4627_s17 = smov 64  }
 0xb99   : > { %1957 = vrot.lane.b32.xlu1 %v4297_v42, %s3850_s22 }
 0xc03   : > { %v4307_v46 = vpop.permute.xlu0 %1815  ;;  %v4309_v7 = vpop.permute.xlu1 %1812 }
 0xc04   : > { %1961 = vrot.lane.b32.xlu1 %v4307_v46, %s3850_s22  ;;  %1959 = vrot.lane.b32.xlu0 %v4309_v7, %s3850_s22  ;;  %v1821_v53 = vcombine.low %v4297_v42, %v4307_v46  ;;  %v1822_v17 = vcombine.high %v4297_v42, %v4307_v46 }
 0xc06   : > { %v1829_v44 = vrot.slane %v1821_v53, %v4024_v25  ;;  %v1836_v55 = vrot.slane %v1822_v17, %v4024_v25 }
 0xc07   : > { %v4315_v47 = vpop.permute.xlu1 %1818 }
 0xc08   : > { %1963 = vrot.lane.b32.xlu0 %v4315_v47, %s3850_s22  ;;  %v1837_v48 = vcombine.low %v4309_v7, %v4315_v47  ;;  %v1838_v50 = vcombine.high %v4309_v7, %v4315_v47 }
 0xc0a   : > { %v1845_v54 = vrot.slane %v1837_v48, %v4024_v25  ;;  %v1852_v43 = vrot.slane %v1838_v50, %v4024_v25 }
 0xc0b   : > { %v1958_v16 = vpop.permute.xlu1 %1957 }
 0xc0c   : > { %v1853_v58 = vcombine.low %v1829_v44, %v1845_v54  ;;  %v1854_v59 = vcombine.high %v1829_v44, %v1845_v54  ;;  %v1869_v60 = vcombine.low %v1836_v55, %v1852_v43  ;;  %v1870_v62 = vcombine.high %v1836_v55, %v1852_v43 }
 0xc0e   : > { %v1861_v10 = vrot.slane %v1853_v58, %v4035_v35  ;;  %v1868_v52 = vrot.slane %v1854_v59, %v4035_v35  ;;  %v1877_v12 = vrot.slane %v1869_v60, %v4035_v35  ;;  %v1884_v13 = vrot.slane %v1870_v62, %v4035_v35 }
 0xc10   : > { %v1889_v26 = vcombine.low %v1861_v10, %v1868_v52  ;;  %v3332_v27 = vcombine.high %v1861_v10, %v1868_v52  ;;  %v1905_v28 = vcombine.low %v1877_v12, %v1884_v13  ;;  %v3333_v30 = vcombine.high %v1877_v12, %v1884_v13 }
 0xc12   : > { %v1896_v15 = vrot.slane %v1889_v26, %v4024_v25  ;;  %v1904_v11 = vrot.slane %v3332_v27, %v4024_v25  ;;  %v1912_v48 = vrot.slane %v1905_v28, %v4024_v25  ;;  %v1920_v50 = vrot.slane %v3333_v30, %v4024_v25 }
 0xc14   : > { %v1937_v58 = vcombine.low %v1912_v48, %v1920_v50  ;;  %v1922_v59 = vcombine.high %v1896_v15, %v1904_v11  ;;  %v1938_v60 = vcombine.high %v1912_v48, %v1920_v50 }
 0xc16   : > { %v1945_v52 = vrot.slane %v1937_v58, %v4035_v35 }
 0xc76   : > { %v1960_v56 = vpop.permute.xlu0 %1959  ;;  %v1962_v57 = vpop.permute.xlu1 %1961 }
 0xc77   : > { %v1969_v63 = vcombine.low %v1958_v16, %v1962_v57  ;;  %v1970_v0 = vcombine.high %v1958_v16, %v1962_v57  ;;  %v1921_v57 = vcombine.low %v1896_v15, %v1904_v11 }
 0xc79   : > { %v1977_v14 = vrot.slane %v1969_v63, %v4024_v25  ;;  %v1984_v18 = vrot.slane %v1970_v0, %v4024_v25  ;;  %v1929_v10 = vrot.slane %v1921_v57, %v4035_v35 }
 0xc7a   : > { %v1964_v4 = vpop.permute.xlu0 %1963 }
 0xc7b   : > { %v1985_v5 = vcombine.low %v1960_v56, %v1964_v4  ;;  %v1986_v9 = vcombine.high %v1960_v56, %v1964_v4 }
 0xc7d   : > { %v1993_v19 = vrot.slane %v1985_v5, %v4024_v25  ;;  %v2000_v20 = vrot.slane %v1986_v9, %v4024_v25 }
 0xc7f   : > { %v2001_v21 = vcombine.low %v1977_v14, %v1993_v19  ;;  %v2002_v22 = vcombine.high %v1977_v14, %v1993_v19  ;;  %v2017_v23 = vcombine.low %v1984_v18, %v2000_v20  ;;  %v2018_v24 = vcombine.high %v1984_v18, %v2000_v20 }
 0xc80   : > { %v1936_v14 = vrot.slane %v1922_v59, %v4035_v35  ;;  %v1952_v18 = vrot.slane %v1938_v60, %v4035_v35 }
 0xc81   : > { %v2009_v33 = vrot.slane %v2001_v21, %v4035_v35  ;;  %v2016_v34 = vrot.slane %v2002_v22, %v4035_v35  ;;  %v2025_v36 = vrot.slane %v2017_v23, %v4035_v35  ;;  %v2032_v37 = vrot.slane %v2018_v24, %v4035_v35 }
 0xc82   : > { %v1953_v22 = vcombine.low %v1929_v10, %v1945_v52  ;;  %v1956_v23 = vcombine.high %v1936_v14, %v1952_v18 }
 0xc83   : > { %v2037_v39 = vcombine.low %v2009_v33, %v2016_v34  ;;  %v3334_v8 = vcombine.high %v2009_v33, %v2016_v34  ;;  %v2053_v41 = vcombine.low %v2025_v36, %v2032_v37  ;;  %v3335_v45 = vcombine.high %v2025_v36, %v2032_v37 }
 0xc84   : > { %v2253_v26 = vpack.c.bf16 %v1953_v22, %v1953_v22  ;;  %v2256_v27 = vpack.c.bf16 %v1956_v23, %v1956_v23  ;;  %v1954_v33 = vcombine.high %v1929_v10, %v1945_v52 }
 0xc85   : > { %v2044_v53 = vrot.slane %v2037_v39, %v4024_v25  ;;  %v2052_v17 = vrot.slane %v3334_v8, %v4024_v25  ;;  %v2060_v16 = vrot.slane %v2053_v41, %v4024_v25  ;;  %v2068_v54 = vrot.slane %v3335_v45, %v4024_v25 }
 0xc86   : > { %v2254_v36 = vpack.c.bf16 %v1954_v33, %v1954_v33  ;;  %v1955_v39 = vcombine.low %v1936_v14, %v1952_v18 }
 0xc87   : > { %v2069_v43 = vcombine.low %v2044_v53, %v2052_v17  ;;  %v2085_v44 = vcombine.low %v2060_v16, %v2068_v54  ;;  %v2070_v55 = vcombine.high %v2044_v53, %v2052_v17  ;;  %v2086_v56 = vcombine.high %v2060_v16, %v2068_v54 }
 0xc88   : > { %v2255_v8 = vpack.c.bf16 %v1955_v39, %v1955_v39 }
 0xc89   : > { %v2077_v62 = vrot.slane %v2069_v43, %v4035_v35  ;;  %v2093_v63 = vrot.slane %v2085_v44, %v4035_v35  ;;  %v2084_v0 = vrot.slane %v2070_v55, %v4035_v35  ;;  %v2100_v4 = vrot.slane %v2086_v56, %v4035_v35 }
 0xc8b   : > { %v2101_v5 = vcombine.low %v2077_v62, %v2093_v63  ;;  %v2104_v9 = vcombine.high %v2084_v0, %v2100_v4  ;;  %v2102_v21 = vcombine.high %v2077_v62, %v2093_v63  ;;  %v2103_v30 = vcombine.low %v2084_v0, %v2100_v4 }
 0xc8d   : > { %v2257_v12 = vpack.c.bf16 %v2101_v5, %v2101_v5  ;;  %v2260_v13 = vpack.c.bf16 %v2104_v9, %v2104_v9  ;;  %v2258_v24 = vpack.c.bf16 %v2102_v21, %v2102_v21  ;;  %v2259_v34 = vpack.c.bf16 %v2103_v30, %v2103_v30 }
 0xc8f   : > { %v2265_v19 = vsel %vm860_vm2, %v2257_v12, 0  ;;  %v2403_v20 = vsel %vm860_vm2, %v2260_v13, 0  ;;  %v2311_v28 = vsel %vm860_vm2, %v2258_v24, 0  ;;  %v2357_v37 = vsel %vm860_vm2, %v2259_v34, 0 }
 0xc90   : > { %3564 = vmatpush3.bf16.xpose.msra.mxu0 %v2265_v19  ;;  %3582 = vmatpush3.bf16.xpose.msra.mxu1 %v2403_v20 }
 0xc91   : > { %3569 = vmatprep.subr.bf16.mxu0 %v3846_v1  ;;  %3593 = vmatprep.subr.bf16.mxu1 %v3846_v1 }
 0xc97   : > { %3566 = vmatmul.mubr.msk.bf16.vlgmr.msra.gmra.mrb[24].mxu0 %vm860_vm2, %v2253_v26  ;;  %3584 = vmatmul.mubr.msk.bf16.vlgmr.msra.gmra.mrb[28].mxu1 %vm860_vm2, %v2256_v27 }
 0xc98   : > { %3570 = vmatpush3.bf16.xpose.msra.mxu0 %v2311_v28  ;;  %3571 = vmatprep.mubr.msk.bf16.mxu0 %vm3847_vm0, %v3846_v1 }
 0xc99   : > { %3575 = vmatprep.subr.bf16.mxu0 %v3846_v1  ;;  %3595 = vmatprep.mubr.msk.bf16.mxu1 %vm3847_vm0, %v3846_v1 }
 0xc9f   : > { %3572 = vmatmul.mubr.msk.bf16.vlgmr.msra.gmra.mrb[28].mxu0 %vm860_vm2, %v2254_v36 }
 0xca0   : > { %3576 = vmatpush3.bf16.xpose.msra.mxu0 %v2357_v37  ;;  %3577 = vmatprep.mubr.msk.bf16.mxu0 %vm3847_vm0, %v3846_v1 }
 0xca1   : > { %3587 = vmatprep.subr.bf16.mxu0 %v3846_v1 }
 0xca7   : > { %3578 = vmatmul.mubr.msk.bf16.vlgmr.msra.gmra.mrb[32].mxu0 %vm860_vm2, %v2255_v8 }
 0xca8   : > { %3589 = vmatprep.mubr.msk.bf16.mxu0 %vm3847_vm0, %v3846_v1 }
 0xd6a   : > { %v2301_v41 = vpop.f32.mrb[24].mxu0  ;;  %v2439_v45 = vpop.f32.mrb[28].mxu1 }
 0xd6b   : > { %v2445_v15 = vmul.f32 0.35355338, %v2301_v41  ;;  %v2448_v11 = vmul.f32 0.35355338, %v2439_v45  ;;  %v3567_v48 = vpop.f32.mrb[25].mxu0  ;;  %v3585_v50 = vpop.f32.mrb[29].mxu1 }
 0xd6c   : > { %v2304_v53 = vpop.f32.mrb[26].mxu0  ;;  %v2442_v17 = vpop.f32.mrb[30].mxu1 }
 0xd6d   : > { %v3568_v16 = vpop.f32.mrb[27].mxu0  ;;  %v3586_v54 = vpop.f32.mrb[31].mxu1  ;;  %v2449_v43 = vadd.f32 %v4089_v61, %v2445_v15  ;;  %v2452_v55 = vadd.f32 %v4089_v61, %v2448_v11 }
 0xd6f   : > { %v2453_v44 = vsel %vm860_vm2, %v2449_v43, -inf  ;;  %v2462_v59 = vsel %vm860_vm2, %v2452_v55, -inf }
 0xd70   : > { %2454 = vmax.xlane.f32.xlu1 %v2453_v44 }
 0xd72   : > { %v2347_v56 = vpop.f32.mrb[28].mxu0 }
 0xd73   : > { %v2446_v57 = vmul.f32 0.35355338, %v2347_v56  ;;  %v3573_v58 = vpop.f32.mrb[29].mxu0 }
 0xd74   : > { %v2350_v60 = vpop.f32.mrb[30].mxu0  ;;  %2463 = vmax.xlane.f32.xlu1 %v2462_v59 }
 0xd75   : > { %v3574_v62 = vpop.f32.mrb[31].mxu0  ;;  %v2450_v63 = vadd.f32 %v4089_v61, %v2446_v57 }
 0xd77   : > { %v2456_v0 = vsel %vm860_vm2, %v2450_v63, -inf }
 0xd78   : > { %2457 = vmax.xlane.f32.xlu0 %v2456_v0 }
 0xd7a   : > { %v2393_v4 = vpop.f32.mrb[32].mxu0 }
 0xd7b   : > { %v2447_v5 = vmul.f32 0.35355338, %v2393_v4  ;;  %v3579_v9 = vpop.f32.mrb[33].mxu0 }
 0xd7c   : > { %v2396_v10 = vpop.f32.mrb[34].mxu0 }
 0xd7d   : > { %v3580_v52 = vpop.f32.mrb[35].mxu0  ;;  %v2451_v12 = vadd.f32 %v4089_v61, %v2447_v5 }
 0xd7f   : > { %v2459_v13 = vsel %vm860_vm2, %v2451_v12, -inf }
 0xd80   : > { %2460 = vmax.xlane.f32.xlu0 %v2459_v13 }
 0xd85   : > { %2107 = vrot.lane.b32.xlu1 %v4309_v7, %s4627_s17 }
 0xd96   : > { %2105 = vrot.lane.b32.xlu0 %v4297_v42, %s4627_s17 }
 0xdfd   : > { %v2455_v14 = vpop.xlane.xlu1 %2454 }
 0xdfe   : > { %v2465_v18 = vsub.f32 %v2449_v43, %v2455_v14 }
 0xe00   : > { %v2469_v19 = vmul.f32 1.442695, %v2465_v18 }
 0xe01   : > { %v2464_v42 = vpop.xlane.xlu1 %2463 }
 0xe02   : > { %3758 = vpow2.f32 %v2469_v19  ;;  %v2468_v26 = vsub.f32 %v2452_v55, %v2464_v42 }
 0xe04   : > { %v2475_v27 = vmul.f32 1.442695, %v2468_v26 }
 0xe05   : > { %v2458_v20 = vpop.xlane.xlu0 %2457  ;;  %v2108_v8 = vpop.permute.xlu1 %2107 }
 0xe06   : > { %v2466_v21 = vsub.f32 %v2450_v63, %v2458_v20 }
 0xe08   : > { %v2471_v22 = vmul.f32 1.442695, %v2466_v21 }
 0xe0a   : > { %3760 = vpow2.f32 %v2471_v22 }
 0xe0b   : > { %3762 = vpow2.f32 %v2475_v27 }
 0xe0c   : > { %v4391_v23 = vpop.eup %3758 }
 0xe0d   : > { %v2477_v61 = vsel %vm860_vm2, %v4391_v23, 0.0  ;;  %v2461_v28 = vpop.xlane.xlu0 %2460 }
 0xe0e   : > { %2478 = vadd.xlane.f32.xlu0 %v2477_v61  ;;  %v2467_v30 = vsub.f32 %v2451_v12, %v2461_v28 }
 0xe10   : > { %v2473_v33 = vmul.f32 1.442695, %v2467_v30 }
 0xe12   : > { %3764 = vpow2.f32 %v2473_v33 }
 0xe14   : > { %v4395_v24 = vpop.eup %3760 }
 0xe15   : > { %v2480_v7 = vsel %vm860_vm2, %v4395_v24, 0.0  ;;  %v4403_v34 = vpop.eup %3762 }
 0xe16   : > { %2481 = vadd.xlane.f32.xlu1 %v2480_v7  ;;  %v2486_v36 = vsel %vm860_vm2, %v4403_v34, 0.0 }
 0xe1c   : > { %v4407_v37 = vpop.eup %3764 }
 0xe24   : > { %2111 = vrot.lane.b32.xlu0 %v4315_v47, %s4627_s17  ;;  %v2483_v47 = vsel %vm860_vm2, %v4407_v37, 0.0 }
 0xe27   : > { %2109 = vrot.lane.b32.xlu1 %v4307_v46, %s4627_s17  ;;  %v2106_v46 = vpop.permute.xlu0 %2105  ;;  %s333_s17 = scalar_lea.vmem [#allocation2], %s332_s26 }
 0xe28   : > { %s3221_s21 = sshll.u32 %s333_s17, 4  ;;  %s4570_s21 = int_to_ptr.vmem [resolvable:$true] %s3221_s21 }
 0xe43   : > { %2487 = vadd.xlane.f32.xlu0 %v2486_v36 }
 0xe4b   : > { %2484 = vadd.xlane.f32.xlu1 %v2483_v47 }
 0xe9b   : > { %v2479_v39 = vpop.xlane.xlu0 %2478 }
 0xe9c   : > { %3766 = vrcp.f32 %v2479_v39 }
 0xe9f   : > { %v2112_v41 = vpop.permute.xlu0 %2111 }
 0xea0   : > { %v2133_v15 = vcombine.low %v2108_v8, %v2112_v41  ;;  %v2134_v11 = vcombine.high %v2108_v8, %v2112_v41 }
 0xea2   : > { %v2141_v17 = vrot.slane %v2133_v15, %v4024_v25  ;;  %v2148_v16 = vrot.slane %v2134_v11, %v4024_v25 }
 0xea3   : > { %v2482_v45 = vpop.xlane.xlu1 %2481 }
 0xea4   : > { %3768 = vrcp.f32 %v2482_v45 }
 0xea6   : > { %v3767_v20 = vpop.eup %3766 }
 0xea7   : > { %v2110_v48 = vpop.permute.xlu1 %2109  ;;  %v2493_v33 = vmul.f32 %v3767_v20, %v4391_v23 }
 0xea8   : > { %v2117_v50 = vcombine.low %v2106_v46, %v2110_v48  ;;  %v2118_v53 = vcombine.high %v2106_v46, %v2110_v48 }
 0xea9   : > { %v2497_v15 = vpack.c.bf16 %v2493_v33, %v2493_v33 }
 0xeaa   : > { %v2125_v54 = vrot.slane %v2117_v50, %v4024_v25  ;;  %v2132_v43 = vrot.slane %v2118_v53, %v4024_v25 }
 0xeac   : > { %v2149_v44 = vcombine.low %v2125_v54, %v2141_v17  ;;  %v2150_v55 = vcombine.high %v2125_v54, %v2141_v17  ;;  %v2165_v56 = vcombine.low %v2132_v43, %v2148_v16  ;;  %v2166_v57 = vcombine.high %v2132_v43, %v2148_v16 }
 0xeae   : > { %v2157_v58 = vrot.slane %v2149_v44, %v4035_v35  ;;  %v2164_v59 = vrot.slane %v2150_v55, %v4035_v35  ;;  %v2173_v60 = vrot.slane %v2165_v56, %v4035_v35  ;;  %v2180_v62 = vrot.slane %v2166_v57, %v4035_v35  ;;  %v3769_v42 = vpop.eup %3768 }
 0xeaf   : > { %v2494_v36 = vmul.f32 %v3769_v42, %v4395_v24 }
 0xeb0   : > { %v2185_v63 = vcombine.low %v2157_v58, %v2164_v59  ;;  %v3336_v0 = vcombine.high %v2157_v58, %v2164_v59  ;;  %v2201_v4 = vcombine.low %v2173_v60, %v2180_v62  ;;  %v3337_v5 = vcombine.high %v2173_v60, %v2180_v62 }
 0xeb1   : > { %v2498_v11 = vpack.c.bf16 %v2494_v36, %v2494_v36 }
 0xeb2   : > { %v2192_v9 = vrot.slane %v2185_v63, %v4024_v25  ;;  %v2200_v10 = vrot.slane %v3336_v0, %v4024_v25  ;;  %v2208_v52 = vrot.slane %v2201_v4, %v4024_v25  ;;  %v2216_v12 = vrot.slane %v3337_v5, %v4024_v25 }
 0xeb4   : > { %v2217_v13 = vcombine.low %v2192_v9, %v2200_v10  ;;  %v2233_v14 = vcombine.low %v2208_v52, %v2216_v12  ;;  %v2218_v18 = vcombine.high %v2192_v9, %v2200_v10  ;;  %v2234_v19 = vcombine.high %v2208_v52, %v2216_v12 }
 0xeb6   : > { %v2225_v21 = vrot.slane %v2217_v13, %v4035_v35  ;;  %v2241_v22 = vrot.slane %v2233_v14, %v4035_v35  ;;  %v2232_v61 = vrot.slane %v2218_v18, %v4035_v35  ;;  %v2248_v7 = vrot.slane %v2234_v19, %v4035_v35 }
 0xeb8   : > { %v2249_v26 = vcombine.low %v2225_v21, %v2241_v22  ;;  %v2250_v27 = vcombine.high %v2225_v21, %v2241_v22  ;;  %v2251_v28 = vcombine.low %v2232_v61, %v2248_v7  ;;  %v2252_v30 = vcombine.high %v2232_v61, %v2248_v7 }
 0xeba   : > { %v2501_v47 = vpack.c.bf16 %v2249_v26, %v2249_v26  ;;  %v2502_v46 = vpack.c.bf16 %v2250_v27, %v2250_v27  ;;  %v2503_v41 = vpack.c.bf16 %v2251_v28, %v2251_v28  ;;  %v2504_v45 = vpack.c.bf16 %v2252_v30, %v2252_v30  ;;  %v3722_v27 = vld [vmem:[%s4613_s3 + $0x10] sm:$0xff]  }
 0xebc   : > { %v2509_v39 = vsel %vm1114_vm3, %v2501_v47, 0  ;;  %v2555_v8 = vsel %vm1114_vm3, %v2502_v46, 0  ;;  %v2601_v23 = vsel %vm1114_vm3, %v2503_v41, 0  ;;  %v2647_v24 = vsel %vm1114_vm3, %v2504_v45, 0  ;;  %v3723_v41 = vld [vmem:[%s4613_s3 + $0x18] sm:$0xff]  }
 0xebd   : > { %3588 = vmatpush3.bf16.msra.mxu0 %v2509_v39  ;;  %3594 = vmatpush3.bf16.msra.mxu1 %v2555_v8 }
 0xebe   : > { %3599 = vmatprep.subr.bf16.mxu0 %v3846_v1  ;;  %3605 = vmatprep.subr.bf16.mxu1 %v3846_v1 }
 0xec0   : > { %3590 = vmatmul.mubr.msk.bf16.vlgmr.msra.gmra.mrb[36].mxu0 %vm860_vm2, %v2497_v15  ;;  %3596 = vmatmul.mubr.msk.bf16.vlgmr.msra.gmra.mrb[32].mxu1 %vm860_vm2, %v2498_v11 }
 0xec1   : > { %3600 = vmatpush3.bf16.msra.mxu0 %v2601_v23  ;;  %3606 = vmatpush3.bf16.msra.mxu1 %v2647_v24 }
 0xec2   : > { %3607 = vmatprep.mubr.msk.bf16.mxu1 %vm3847_vm0, %v3846_v1  ;;  %3601 = vmatprep.mubr.msk.bf16.mxu0 %vm3847_vm0, %v3846_v1 }
 0xec3   : > { %3611 = vmatprep.subr.bf16.mxu0 %v3846_v1  ;;  %3619 = vmatprep.subr.bf16.mxu1 %v3846_v1 }
 0xed0   : > { %v2488_v48 = vpop.xlane.xlu0 %2487 }
 0xed1   : > { %3770 = vrcp.f32 %v2488_v48 }
 0xed8   : > { %v2485_v50 = vpop.xlane.xlu1 %2484 }
 0xed9   : > { %3772 = vrcp.f32 %v2485_v50 }
 0xedb   : > { %v3771_v53 = vpop.eup %3770 }
 0xedc   : > { %v2496_v17 = vmul.f32 %v3771_v53, %v4403_v34 }
 0xede   : > { %v2500_v16 = vpack.c.bf16 %v2496_v17, %v2496_v17 }
 0xee0   : > { %3608 = vmatmul.mubr.msk.bf16.vlgmr.msra.gmra.mrb[36].mxu1 %vm860_vm2, %v2500_v16 }
 0xee1   : > { %3623 = vmatprep.mubr.msk.bf16.mxu1 %vm3847_vm0, %v3846_v1 }
 0xee3   : > { %v3773_v54 = vpop.eup %3772 }
 0xee4   : > { %v2495_v43 = vmul.f32 %v3773_v54, %v4407_v37 }
 0xee6   : > { %v2499_v44 = vpack.c.bf16 %v2495_v43, %v2495_v43 }
 0xee8   : > { %3602 = vmatmul.mubr.msk.bf16.vlgmr.msra.gmra.mrb[40].mxu0 %vm860_vm2, %v2499_v44 }
 0xee9   : > { %3615 = vmatprep.mubr.msk.bf16.mxu0 %vm3847_vm0, %v3846_v1  ;;  %3612 = vmatpush3.bf16.msra.mxu0 %v3722_v27 }
 0xeea   : > { %3613 = vmatprep.subr.bf16.mxu0 %v3846_v1 }
 0xeed   : > { %3614 = vmatpush3.bf16.msra.mxu0 %v3723_v41  ;;  %v2938_v41 = vrot.slane %v4292_v40, %v1545_v49  ;;  %v3024_v49 = vrot.slane %v4292_v40, %v1630_v2  ;;  %v3734_v2 = vld [vmem:[%s4617_s7] sm:$0xff]  }
 0xeee   : > { %3627 = vmatprep.subr.bf16.mxu0 %v3846_v1 }
 0xf93   : > { %v2545_v55 = vpop.f32.mrb[36].mxu0  ;;  %v2591_v56 = vpop.f32.mrb[32].mxu1 }
 0xf94   : > { %v3591_v57 = vpop.f32.mrb[37].mxu0  ;;  %v3597_v58 = vpop.f32.mrb[33].mxu1 }
 0xf95   : > { %v2548_v34 = vpop.f32.mrb[38].mxu0  ;;  %v2594_v59 = vpop.f32.mrb[34].mxu1 }
 0xf96   : > { %v3592_v60 = vpop.f32.mrb[39].mxu0  ;;  %v3598_v62 = vpop.f32.mrb[35].mxu1 }
 0xfb3   : > { %v2683_v63 = vpop.f32.mrb[36].mxu1 }
 0xfb4   : > { %v2705_v0 = vcombine.low %v2591_v56, %v2683_v63  ;;  %v2706_v4 = vcombine.high %v2591_v56, %v2683_v63  ;;  %v3609_v5 = vpop.f32.mrb[37].mxu1  ;;  %v2849_v63 = vrot.slane %v4292_v40, %v1456_v51  ;;  %v3724_v51 = vld [vmem:[%s4614_s4 + $0x10] sm:$0xff]  }
 0xfb5   : > { %v2686_v9 = vpop.f32.mrb[38].mxu1  ;;  %3620 = vmatpush3.bf16.msra.mxu1 %v3724_v51 }
 0xfb6   : > { %v3610_v37 = vpop.f32.mrb[39].mxu1  ;;  %v2713_v18 = vrot.slane %v2705_v0, %v4024_v25  ;;  %v2720_v19 = vrot.slane %v2706_v4, %v4024_v25  ;;  %3621 = vmatprep.subr.bf16.mxu1 %v3846_v1 }
 0xfbb   : > { %v2637_v10 = vpop.f32.mrb[40].mxu0 }
 0xfbc   : > { %v2689_v52 = vcombine.low %v2545_v55, %v2637_v10  ;;  %v2690_v12 = vcombine.high %v2545_v55, %v2637_v10  ;;  %v3603_v13 = vpop.f32.mrb[41].mxu0 }
 0xfbd   : > { %v2640_v14 = vpop.f32.mrb[42].mxu0 }
 0xfbe   : > { %v2697_v20 = vrot.slane %v2689_v52, %v4024_v25  ;;  %v2704_v21 = vrot.slane %v2690_v12, %v4024_v25  ;;  %v3604_v22 = vpop.f32.mrb[43].mxu0 }
 0xfc0   : > { %v2721_v61 = vcombine.low %v2697_v20, %v2713_v18  ;;  %v2722_v7 = vcombine.high %v2697_v20, %v2713_v18  ;;  %v2737_v42 = vcombine.low %v2704_v21, %v2720_v19  ;;  %v2738_v26 = vcombine.high %v2704_v21, %v2720_v19  ;;  %v3725_v20 = vld [vmem:[%s4614_s4 + $0x18] sm:$0xff]  }
 0xfc1   : > { %3622 = vmatpush3.bf16.msra.mxu1 %v3725_v20 }
 0xfc2   : > { %v2729_v28 = vrot.slane %v2721_v61, %v4035_v35  ;;  %v2736_v30 = vrot.slane %v2722_v7, %v4035_v35  ;;  %v2745_v33 = vrot.slane %v2737_v42, %v4035_v35  ;;  %v2752_v36 = vrot.slane %v2738_v26, %v4035_v35  ;;  %3647 = vmatprep.subr.bf16.mxu1 %v3846_v1 }
 0xfc3   : > { %v2922_v61 = vrot.slane %v4292_v40, %v1530_v31  ;;  %v2927_v26 = vrot.slane %v4292_v40, %v1535_v32  ;;  %v3727_v31 = vld [vmem:[%s4615_s5 + $0x48] sm:$0xff]   ;;  %v3728_v32 = vld [vmem:[%s4615_s5 + $0x50] sm:$0xff]  }
 0xfc4   : > { %v2757_v47 = vcombine.low %v2729_v28, %v2736_v30  ;;  %v3346_v46 = vcombine.high %v2729_v28, %v2736_v30  ;;  %v2773_v39 = vcombine.low %v2745_v33, %v2752_v36  ;;  %v3347_v8 = vcombine.high %v2745_v33, %v2752_v36  ;;  %v3726_v33 = vld [vmem:[%s4615_s5 + $0x40] sm:$0xff]   ;;  %v3729_v36 = vld [vmem:[%s4615_s5 + $0x58] sm:$0xff]  }
 0xfc6   : > { %v2764_v45 = vrot.slane %v2757_v47, %v4024_v25  ;;  %v2772_v15 = vrot.slane %v3346_v46, %v4024_v25  ;;  %v2780_v11 = vrot.slane %v2773_v39, %v4024_v25  ;;  %v2788_v23 = vrot.slane %v3347_v8, %v4024_v25  ;;  %v3730_v47 = vld [vmem:[%s4615_s5 + $0x60] sm:$0xff]   ;;  %v3731_v46 = vld [vmem:[%s4615_s5 + $0x68] sm:$0xff]   ;;  %v3732_v39 = vld [vmem:[%s4615_s5 + $0x70] sm:$0xff]  }
 0xfc7   : > { %v3733_v8 = vld [vmem:[%s4615_s5 + $0x78] sm:$0xff]  }
 0xfc8   : > { %v2790_v24 = vcombine.high %v2764_v45, %v2772_v15  ;;  %v2806_v48 = vcombine.high %v2780_v11, %v2788_v23  ;;  %v2789_v50 = vcombine.low %v2764_v45, %v2772_v15  ;;  %v2805_v53 = vcombine.low %v2780_v11, %v2788_v23 }
 0xfca   : > { %v2804_v17 = vrot.slane %v2790_v24, %v4035_v35  ;;  %v2820_v16 = vrot.slane %v2806_v48, %v4035_v35  ;;  %v2797_v54 = vrot.slane %v2789_v50, %v4035_v35  ;;  %v2813_v43 = vrot.slane %v2805_v53, %v4035_v35 }
 0xfcc   : > { %v2823_v44 = vcombine.low %v2804_v17, %v2820_v16  ;;  %v2822_v55 = vcombine.high %v2797_v54, %v2813_v43  ;;  %v2824_v56 = vcombine.high %v2804_v17, %v2820_v16  ;;  %v2821_v57 = vcombine.low %v2797_v54, %v2813_v43 }
 0xfce   : > { %2830 = vrot.lane.b32.xlu1 %v2823_v44, %s4628_s25  ;;  %2826 = vrot.lane.b32.xlu0 %v2822_v55, %s4629_s28  ;;  %s3209_s25 = scalar_lea.sflag [#allocation3], %s332_s26  ;;  %s3782_s28 = scalar_lea.vmem %s4570_s21, 16 }
 0xfcf   : > { %p3783_p11 = scmp.ne.s32.totalorder %s4570_s21, %s3782_s28 }
 0xfd1   : > { %p3784_p12 = pnand %p3783_p11, %p3947_p5 }
 0xfd2   : > { %2834 = vrot.lane.b32.xlu1 %v2824_v56, %s4630_s29  ;;  %s3786_s29 = sshll.u32 %s3858_s13, 4  ;;  %s3787_s29 = int_to_ptr.vmem [resolvable:$false] %s3786_s29 }
 0xfd3   : > { %p3785_p13 = pneg %p3784_p12  ;;  %s3788_s14 = scalar_lea.vmem %s3787_s29, 32 }
 0xfd4   : > { %p3789_p0 = scmp.lt.s32.totalorder %s4570_s21, %s3787_s29  ;;  %p3790_p1 = scmp.lt.s32.totalorder %s3788_s14, %s3782_s28 }
 0xfd6   : > { %p3791_p2 = por %p3790_p1, %p3789_p0 }
 0xfd8   : > { %p3792_p3 = pnand %p3791_p2, %p3785_p13 }
0x1040   : > { %v2831_v25 = vpop.permute.xlu1 %2830  ;;  %v2827_v58 = vpop.permute.xlu0 %2826 }
0x1041   : > { %v2837_v34 = vsel %vm860_vm2, %v2821_v57, %v2827_v58 }
0x1042   : > { %v2838_v60 = vsel %vm1445_vm4, %v2837_v34, %v2831_v25 }
0x1044   : > { %v2835_v59 = vpop.permute.xlu1 %2834 }
0x1045   : > { %v2839_v62 = vsel %vm1447_vm5, %v2838_v60, %v2835_v59 }
0x1046   : > { %v2840_v35 = vpack.c.bf16 %v2839_v62, %v2839_v62 }
0x1048   : > { %3616 = vmatmul.mubr.msk.bf16.vlgmr.msra.gmra.mrb[44].mxu0 %vm366_vm1, %v2840_v35 }
0x1049   : > { %3643 = vmatprep.mubr.msk.bf16.mxu0 %vm3847_vm0, %v3846_v1  ;;  %3628 = vmatpush3.bf16.msra.mxu0 %v3726_v33 }
0x104a   : > { %3629 = vmatprep.subr.bf16.mxu0 %v3846_v1 }
0x104d   : > { %3630 = vmatpush3.bf16.msra.mxu0 %v3727_v31 }
0x104e   : > { %3631 = vmatprep.subr.bf16.mxu0 %v3846_v1 }
0x1051   : > { %3632 = vmatpush3.bf16.msra.mxu0 %v3728_v32 }
0x1052   : > { %3633 = vmatprep.subr.bf16.mxu0 %v3846_v1 }
0x1055   : > { %3634 = vmatpush3.bf16.msra.mxu0 %v3729_v36 }
0x1056   : > { %3635 = vmatprep.subr.bf16.mxu0 %v3846_v1 }
0x1059   : > { %3636 = vmatpush3.bf16.msra.mxu0 %v3730_v47 }
0x105a   : > { %3637 = vmatprep.subr.bf16.mxu0 %v3846_v1 }
0x105d   : > { %3638 = vmatpush3.bf16.msra.mxu0 %v3731_v46 }
0x105e   : > { %3639 = vmatprep.subr.bf16.mxu0 %v3846_v1 }
0x1061   : > { %3640 = vmatpush3.bf16.msra.mxu0 %v3732_v39 }
0x1062   : > { %3641 = vmatprep.subr.bf16.mxu0 %v3846_v1 }
0x1065   : > { %3642 = vmatpush3.bf16.msra.mxu0 %v3733_v8 }
0x111b   : > { %v2899_v0 = vpop.f32.mrb[44].mxu0 }
0x111c   : > { %v2900_v4 = vadd.f32 %v2899_v0, %v2849_v63  ;;  %v3617_v5 = vpop.f32.mrb[45].mxu0 }
0x111d   : > { %v2902_v9 = vpop.f32.mrb[46].mxu0 }
0x111e   : > { %v3618_v37 = vpop.f32.mrb[47].mxu0  ;;  %v2905_v10 = vadd.f32 %v2900_v4, %v4282_v38  ;;  %v3735_v9 = vld [vmem:[%s4617_s7 + $0x8] sm:$0xff]  }
0x1120   : > { %v2906_v52 = vsel %vm366_vm1, %v2905_v10, 0.0 }
0x1121   : > { %2907 = vadd.xlane.f32.xlu0 %v2906_v52 }
0x11ae   : > { %v2908_v12 = vpop.xlane.xlu0 %2907 }
0x11af   : > { %v2909_v13 = vmul.f32 0.03125, %v2908_v12  ;;  %v3130_v12 = vrot.slane %v4292_v40, %v1736_v3 }
0x11b1   : > { %v2910_v14 = vsub.f32 %v2905_v10, %v2909_v13 }
0x11b3   : > { %v2911_v18 = vmul.f32 %v2910_v14, %v2910_v14 }
0x11b5   : > { %v2912_v19 = vsel %vm366_vm1, %v2911_v18, 0.0  ;;  %v3135_v18 = vrot.slane %v4292_v40, %v1741_v29 }
0x11b6   : > { %2913 = vadd.xlane.f32.xlu1 %v2912_v19 }
0x1243   : > { %v2914_v38 = vpop.xlane.xlu1 %2913 }
0x1244   : > { %v2915_v21 = vmul.f32 0.03125, %v2914_v38 }
0x1246   : > { %v2916_v22 = vadd.f32 1e-07, %v2915_v21 }
0x1248   : > { %3774 = vrsqrt.f32 %v2916_v22 }
0x1252   : > { %v3775_v7 = vpop.eup %3774 }
0x1253   : > { %v2918_v42 = vmul.f32 %v3775_v7, %v2910_v14 }
0x1255   : > { %v2923_v27 = vmul.f32 %v2922_v61, %v2918_v42 }
0x1257   : > { %v2928_v28 = vadd.f32 %v2927_v26, %v2923_v27 }
0x1259   : > { %v2929_v30 = vpack.c.bf16 %v2928_v28, %v2928_v28 }
0x125b   : > { %3624 = vmatmul.mubr.msk.bf16.vlgmr.msra.gmra.mrb[40].mxu1 %vm366_vm1, %v2929_v30 }
0x125c   : > { %3651 = vmatprep.mubr.msk.bf16.mxu1 %vm3847_vm0, %v3846_v1  ;;  %3648 = vmatpush3.bf16.msra.mxu1 %v3734_v2 }
0x125d   : > { %3649 = vmatprep.subr.bf16.mxu1 %v3846_v1  ;;  %v3142_v1 = vld [vmem:[%s4618_s8] sm:$0x1] }
0x1260   : > { %3650 = vmatpush3.bf16.msra.mxu1 %v3735_v9 }
0x132e   : > { %v2988_v45 = vpop.f32.mrb[40].mxu1 }
0x132f   : > { %v2989_v15 = vadd.f32 %v2988_v45, %v2938_v41  ;;  %v3625_v11 = vpop.f32.mrb[41].mxu1 }
0x1330   : > { %v2991_v23 = vpop.f32.mrb[42].mxu1 }
0x1331   : > { %v2994_v24 = vmul.f32 %v2989_v15, %v2989_v15  ;;  %v3626_v48 = vpop.f32.mrb[43].mxu1 }
0x1333   : > { %v2995_v50 = vmul.f32 %v2994_v24, %v2989_v15 }
0x1335   : > { %v2996_v53 = vmul.f32 0.044715, %v2995_v50 }
0x1337   : > { %v2997_v17 = vadd.f32 %v2996_v53, %v2989_v15 }
0x1339   : > { %v2998_v16 = vmul.f32 0.7978846, %v2997_v17 }
0x133b   : > { %3776 = vtanh.f32 %v2998_v16 }
0x1345   : > { %v3777_v54 = vpop.eup %3776 }
0x1346   : > { %v3000_v43 = vadd.f32 1.0, %v3777_v54 }
0x1348   : > { %v3001_v44 = vmul.f32 0.5, %v3000_v43 }
0x134a   : > { %v3002_v55 = vmul.f32 %v3001_v44, %v2989_v15 }
0x134c   : > { %v3003_v56 = vpack.c.bf16 %v3002_v55, %v3002_v55 }
0x134e   : > { %3644 = vmatmul.mubr.bf16.vlgmr.msra.gmra.mrb[48].mxu0 %v3003_v56 }
0x1421   : > { %v3107_v57 = vpop.f32.mrb[48].mxu0 }
0x1422   : > { %v3108_v25 = vadd.f32 %v3107_v57, %v3024_v49  ;;  %v3645_v58 = vpop.f32.mrb[49].mxu0 }
0x1423   : > { %v3110_v34 = vpop.f32.mrb[50].mxu0 }
0x1424   : > { %v3646_v59 = vpop.f32.mrb[51].mxu0  ;;  %v3113_v60 = vadd.f32 %v3108_v25, %v2928_v28 }
0x1426   : > { %v3114_v62 = vsel %vm366_vm1, %v3113_v60, 0.0 }
0x1427   : > { %3115 = vadd.xlane.f32.xlu0 %v3114_v62 }
0x14b4   : > { %v3116_v35 = vpop.xlane.xlu0 %3115 }
0x14b5   : > { %v3117_v63 = vmul.f32 0.03125, %v3116_v35 }
0x14b7   : > { %v3118_v0 = vsub.f32 %v3113_v60, %v3117_v63 }
0x14b9   : > { %v3119_v4 = vmul.f32 %v3118_v0, %v3118_v0 }
0x14bb   : > { %v3120_v5 = vsel %vm366_vm1, %v3119_v4, 0.0 }
0x14bc   : > { %3121 = vadd.xlane.f32.xlu0 %v3120_v5 }
0x1549   : > { %v3122_v37 = vpop.xlane.xlu0 %3121 }
0x154a   : > { %v3123_v10 = vmul.f32 0.03125, %v3122_v37 }
0x154c   : > { %v3124_v52 = vadd.f32 1e-07, %v3123_v10 }
0x154e   : > { %3778 = vrsqrt.f32 %v3124_v52 }
0x1558   : > { %v3779_v13 = vpop.eup %3778 }
0x1559   : > { %v3126_v14 = vmul.f32 %v3779_v13, %v3118_v0 }
0x155b   : > { %v3131_v19 = vmul.f32 %v3130_v12, %v3126_v14 }
0x155d   : > { %v3136_v51 = vadd.f32 %v3135_v18, %v3131_v19 }
0x155f   : > { %v3137_v20 = vpack.c.bf16 %v3136_v51, %v3136_v51 }
0x1561   : > { %3652 = vmatmul.mubr.msk.bf16.vlgmr.msra.gmra.mrb[44].mxu1 %vm366_vm1, %v3137_v20 }
0x1634   : > { %v3192_v38 = vpop.f32.mrb[44].mxu1 }
0x1635   : > { %v3193_v21 = vadd.f32 %v3192_v38, %v3142_v1  ;;  %v3653_v3 = vpop.f32.mrb[45].mxu1 }
0x1636   : > { %v3195_v22 = vpop.f32.mrb[46].mxu1 }
0x1637   : > { %v3198_v61 = vmul.f32 %v3193_v21, %v3193_v21  ;;  %v3654_v7 = vpop.f32.mrb[47].mxu1 }
0x1639   : > { %v3199_v6 = vmul.f32 %v3198_v61, %v3193_v21 }
0x163b   : > { %v3200_v42 = vmul.f32 0.044715, %v3199_v6 }
0x163d   : > { %v3201_v29 = vadd.f32 %v3200_v42, %v3193_v21 }
0x163f   : > { %v3202_v40 = vmul.f32 0.7978846, %v3201_v29 }
0x1641   : > { %3780 = vtanh.f32 %v3202_v40 }
0x164b   : > { %v3781_v26 = vpop.eup %3780 }
0x164c   : > { %v3204_v27 = vadd.f32 1.0, %v3781_v26 }
0x164e   : > { %v3205_v28 = vmul.f32 0.5, %v3204_v27 }
0x1650   : > { %v3206_v30 = vmul.f32 %v3205_v28, %v3193_v21 }
0x1652   : > { %3207 = vst [vmem:[%s333_s17] sm:$0x1] %v3206_v30 }
0x1653   : > { %3795 = shalt.err (!%p3792_p3)
}
0x1654   : > { %s3796_s16 = scalar_lea.hbm %s4568_s24, 16  ;;  %s3800_s17 = scalar_lea.hbm %s4619_s9, 32 }
0x1655   : > { %p3797_p4 = scmp.ne.s32.totalorder %s4568_s24, %s3796_s16  ;;  %p3801_p9 = scmp.lt.u32.totalorder %s4568_s24, %s4619_s9 }
0x1656   : > { %p3802_p10 = scmp.lt.u32.totalorder %s3800_s17, %s3796_s16  ;;  %p3804_p12 = scmp.lt.u32.totalorder %s3796_s16, %s4568_s24 }
0x1657   : > { %p3798_p7 = pnand %p3797_p4, %p3947_p5 }
0x1658   : > { %p3803_p11 = por %p3802_p10, %p3801_p9 }
0x1659   : > { %p3799_p8 = pneg %p3798_p7 }
0x165a   : > { %p3805_p13 = por %p3804_p12, %p3803_p11 }
0x165c   : > { %p3806_p0 = pnand %p3805_p13, %p3799_p8 }
0x165e   : > { %3809 = shalt.err (!%p3806_p0)
}
0x165f   : > { %3655 = dma.vmem_to_hbm [thread:$0]  (%p3947_p5), %s4570_s21, 16, %s4568_s24, %s3209_s25  }
0x1660 PF: > { %p3661_p1 = scmp.ge.s32.totalorder %s3844_s12, 2  ;;  %s3233_s28 = sand.u32 1, %s3832_s30  }
0x1661   : > { %s3234_s13 = scalar_lea.sflag [#allocation3], %s3233_s28 }
0x1662   : > { %p3658_p2 = pnand %p3661_p1, %p3951_p6 }
0x1664   : > { %3827 = dma.done.wait (!%p3658_p2), %s3234_s13, 16  }
0x1665   : > { %3829 = vsyncadd (!%p3658_p2), %s3234_s13, 4294967280  ;;  %p19_p3 = scmp.ge.s32.totalorder %s3934_s15, 4   ;;  %s4631_s30 = smov %s3836_s10 }
0x1666   : > { %s4632_s10 = smov %s3840_s11  ;;  %s4633_s11 = smov %s3945_s18 }
0x1667   : > { %s4634_s12 = smov %s3934_s15  ;;  %21 = sbr.rel (!%p19_p3) target bundleno = 3 (0x3), region = 99 }
0x166e   :  { %3238 = vsyncpa [#allocation3], 1 }
0x166f   :  { %3240 = vsyncpa [#allocation3 + $0x1], 1 }

</bundles_post_ra>
